<compile_context>
chip_gen: v7x
topology: tpu7x:2x2x1
jax: 0.10.0
libtpu: 0.0.40
codegen_flags: <defaults>
</compile_context>

<pallas_src>
import numpy as np

import jax
import jax.numpy as jnp
from jax.experimental import pallas as pl
from jax.experimental.pallas import tpu as pltpu


# ----------------------------------------------------------------------------
# Fused kernel: whole SSCritic forward on a block of rows.
# ----------------------------------------------------------------------------
def _sscritic_kernel(x_ref, lat_ref,
                     t1_ref, b1_ref, t2_ref, b2_ref,
                     wf_ref, bf_ref,
                     wa_ref, wb_ref, bo1_ref,
                     wo2_ref, bo2_ref,
                     o_ref):
    def mm(act_f32, w_bf16_ref):
        # bf16 operands on the MXU, f32 accumulate.
        return jnp.dot(act_f32.astype(jnp.bfloat16), w_bf16_ref[...],
                       preferred_element_type=jnp.float32)

    # conv1 (exact Toeplitz GEMM) + bias + ReLU : (bm, 1024) -> (bm, 512)
    h = jnp.maximum(mm(x_ref[...], t1_ref) + b1_ref[...], 0.0)
    # conv2 + bias + ReLU : (bm, 512) -> (bm, 256)   (already NCHW-flat order)
    h = jnp.maximum(mm(h, t2_ref) + b2_ref[...], 0.0)
    # fc1 + ReLU : (bm, 256) -> (bm, 32)
    h = jnp.maximum(mm(h, wf_ref) + bf_ref[...], 0.0)
    # out1 + ReLU, with concat(latent) folded in via split weights (VPU path).
    lat = lat_ref[...]                                    # (bm, 2) f32
    lat_contrib = (lat[:, 0:1] * wb_ref[0:1, :] +         # (bm,1)*(1,32)
                   lat[:, 1:2] * wb_ref[1:2, :])
    h = jnp.maximum(mm(h, wa_ref) + lat_contrib + bo1_ref[...], 0.0)
    # out2 as VPU multiply + lane reduction (no N=1 MXU matmul).
    o_ref[...] = (jnp.sum(h * wo2_ref[...], axis=-1, keepdims=True)
                  + bo2_ref[...]).astype(o_ref.dtype)


def _pick_bm(m):
    """Row block: up to 512, and >=2 grid steps for non-trivial batches so the
    'parallel' axis can shard across v7x's two TensorCores."""
    if m <= 16:
        return m                          # tiny batch: one step, block == full M
    bm = ((pl.cdiv(m, 2) + 7) // 8) * 8   # sublane-aligned half of the batch
    return min(bm, 512)


def _fused_call(kp, x_flat, lat):
    """x_flat: (M, 1024) f32, lat: (M, 2) f32 -> (M, 1) f32."""
    m = x_flat.shape[0]
    bm = _pick_bm(m)
    grid = (pl.cdiv(m, bm),)

    weights = [kp["t1"], kp["b1"], kp["t2"], kp["b2"],
               kp["w_fc1"], kp["b_fc1"],
               kp["w_o1a"], kp["w_o1b"], kp["b_o1"],
               kp["w_o2"], kp["b_o2"]]

    def full_spec(a):
        # Grid-invariant weight: constant index_map -> DMA'd once, stays resident.
        return pl.BlockSpec(a.shape, lambda i: (0,) * a.ndim)

    return pl.pallas_call(
        _sscritic_kernel,
        out_shape=jax.ShapeDtypeStruct((m, 1), jnp.float32),
        grid=grid,
        in_specs=[pl.BlockSpec((bm, x_flat.shape[1]), lambda i: (i, 0)),
                  pl.BlockSpec((bm, 2), lambda i: (i, 0))]
                 + [full_spec(w) for w in weights],
        out_specs=pl.BlockSpec((bm, 1), lambda i: (i, 0)),
        compiler_params=pltpu.CompilerParams(
            dimension_semantics=("parallel",),
            vmem_limit_bytes=32 * 1024 * 1024),
    )(x_flat, lat, *weights)


# ----------------------------------------------------------------------------
# Parameters (PyTorch layouts) and one-time kernel-layout preprocessing.
# ----------------------------------------------------------------------------
def init_sscritic_params(key):
    ks = jax.random.split(key, 10)
    scale = 0.1
    return {
        # base_net
        "conv1_w": scale * jax.random.normal(ks[0], (8, 4, 3, 3), jnp.float32),
        "conv1_b": scale * jax.random.normal(ks[1], (8,), jnp.float32),
        "conv2_w": scale * jax.random.normal(ks[2], (16, 8, 3, 3), jnp.float32),
        "conv2_b": scale * jax.random.normal(ks[3], (16,), jnp.float32),
        "fc1_w": scale * jax.random.normal(ks[4], (32, 16 * 4 * 4), jnp.float32),
        "fc1_b": scale * jax.random.normal(ks[5], (32,), jnp.float32),
        # out_net
        "out1_w": scale * jax.random.normal(ks[6], (32, 34), jnp.float32),
        "out1_b": scale * jax.random.normal(ks[7], (32,), jnp.float32),
        "out2_w": scale * jax.random.normal(ks[8], (1, 32), jnp.float32),
        "out2_b": scale * jax.random.normal(ks[9], (1,), jnp.float32),
    }


def _conv_toeplitz(weight, in_hw, stride, pad):
    """Exact dense matrix T (Cin*H*W, Cout*Ho*Wo), NCHW-flat on both sides,
    so that x.reshape(N, -1) @ T == conv2d(x, weight).reshape(N, -1)."""
    w = np.asarray(weight, np.float32)
    cout, cin, kh, kw = w.shape
    h, wd = in_hw
    ho = (h + 2 * pad - kh) // stride + 1
    wo = (wd + 2 * pad - kw) // stride + 1
    t = np.zeros((cin * h * wd, cout * ho * wo), np.float32)
    co_base = np.arange(cout) * (ho * wo)
    for ci in range(cin):
        for i in range(kh):
            for j in range(kw):
                for p in range(ho):
                    y = stride * p + i - pad
                    if y < 0 or y >= h:
                        continue
                    for q in range(wo):
                        x = stride * q + j - pad
                        if x < 0 or x >= wd:
                            continue
                        row = ci * h * wd + y * wd + x
                        t[row, co_base + p * wo + q] += w[:, ci, i, j]
    return jnp.asarray(t)


def prepare_kernel_params(params):
    """One-time layout preprocessing (outside the forward / jit path).
    MXU weights are stored bf16; VPU-side biases / latent weights stay f32."""
    bf16 = jnp.bfloat16
    f32 = jnp.float32
    return {
        "t1": _conv_toeplitz(params["conv1_w"], (16, 16), 2, 1).astype(bf16),   # (1024, 512)
        "b1": jnp.repeat(params["conv1_b"], 8 * 8).reshape(1, -1).astype(f32),  # (1, 512)
        "t2": _conv_toeplitz(params["conv2_w"], (8, 8), 2, 1).astype(bf16),     # (512, 256)
        "b2": jnp.repeat(params["conv2_b"], 4 * 4).reshape(1, -1).astype(f32),  # (1, 256)
        "w_fc1": params["fc1_w"].T.astype(bf16),                                # (256, 32)
        "b_fc1": params["fc1_b"].reshape(1, -1).astype(f32),                    # (1, 32)
        "w_o1a": params["out1_w"][:, :32].T.astype(bf16),                       # (32, 32)
        "w_o1b": params["out1_w"][:, 32:].T.astype(f32),                        # (2, 32) VPU
        "b_o1": params["out1_b"].reshape(1, -1).astype(f32),                    # (1, 32)
        "w_o2": params["out2_w"].astype(f32),                                   # (1, 32) VPU row
        "b_o2": params["out2_b"].reshape(1, -1).astype(f32),                    # (1, 1)
    }


# ----------------------------------------------------------------------------
# Forward (mirrors SSCritic.forward), jit-compiled.
# ----------------------------------------------------------------------------
@jax.jit
def sscritic_forward(kparams, inp, pre_output_latent):
    """inp: (C,H,W), (N,C,H,W) or (T,N,C,H,W) f32 NCHW.
    pre_output_latent: (3, N) f32; last row dropped, transposed, concatenated.
    Returns (N,) or (T, N) f32."""
    lat = pre_output_latent[:-1, :].T.astype(jnp.float32)   # (N, 2)
    shape_len = inp.ndim
    if shape_len == 3:
        inp = inp[None]
        shape_len = 4
    if shape_len == 4:
        x_flat = inp.reshape(inp.shape[0], -1).astype(jnp.float32)   # NCHW flat
        return _fused_call(kparams, x_flat, lat)[:, 0]
    elif shape_len == 5:
        t, n = inp.shape[:2]
        x_flat = inp.reshape(t * n, -1).astype(jnp.float32)          # fold T into batch
        lat_t = jnp.tile(lat, (t, 1))                                # same latent per step
        return _fused_call(kparams, x_flat, lat_t)[:, 0].reshape(t, n)
    else:
        raise Exception("Invalid input shape")


# ----------------------------------------------------------------------------
# Pure-JAX reference (PyTorch semantics, f32) for a correctness check.
# ----------------------------------------------------------------------------
def reference_forward(params, inp, pre_output_latent):
    def conv(x, w, b, stride, pad):
        y = jax.lax.conv_general_dilated(
            x, w, (stride, stride), [(pad, pad), (pad, pad)],
            dimension_numbers=("NCHW", "OIHW", "NCHW"))
        return y + b[None, :, None, None]

    def single(x4):
        h = jax.nn.relu(conv(x4, params["conv1_w"], params["conv1_b"], 2, 1))
        h = jax.nn.relu(conv(h, params["conv2_w"], params["conv2_b"], 2, 1))
        h = h.reshape(h.shape[0], -1)
        h = jax.nn.relu(h @ params["fc1_w"].T + params["fc1_b"])
        lat = pre_output_latent[:-1, :].T
        h = jnp.concatenate([h, lat], axis=1)
        h = jax.nn.relu(h @ params["out1_w"].T + params["out1_b"])
        return (h @ params["out2_w"].T + params["out2_b"])[:, 0]

    if inp.ndim == 3:
        return single(inp[None])
    if inp.ndim == 4:
        return single(inp)
    return jnp.stack([single(inp[t]) for t in range(inp.shape[0])])


if __name__ == "__main__":
    key = jax.random.PRNGKey(0)
    kp, kx, kl = jax.random.split(key, 3)

    params = init_sscritic_params(kp)
    kparams = prepare_kernel_params(params)          # one-time layout prep (bf16 weights)

    batch = 2
    x = jax.random.normal(kx, (batch, 4, 16, 16), jnp.float32)           # NCHW
    pre_output_latent = jax.random.normal(kl, (3, batch), jnp.float32)   # (3, N)

    # 4-D path
    out = jax.block_until_ready(sscritic_forward(kparams, x, pre_output_latent))
    assert out.shape == (batch,) and out.dtype == jnp.float32, out.shape
    ref = np.asarray(reference_forward(params, x, pre_output_latent))
    assert np.allclose(np.asarray(out), ref, atol=2e-2, rtol=2e-2), (out, ref)

    # 5-D (sequence) path: time folded into batch -> single fused launch.
    seq = 3
    x5 = jax.random.normal(kx, (seq, batch, 4, 16, 16), jnp.float32)
    out5 = jax.block_until_ready(sscritic_forward(kparams, x5, pre_output_latent))
    assert out5.shape == (seq, batch), out5.shape
    ref5 = np.asarray(reference_forward(params, x5, pre_output_latent))
    assert np.allclose(np.asarray(out5), ref5, atol=2e-2, rtol=2e-2)

    # 3-D (single frame) path
    out3 = jax.block_until_ready(
        sscritic_forward(kparams, x[0], pre_output_latent[:, :1]))
    assert out3.shape == (1,), out3.shape

    print("KERNEL_OK")
</pallas_src>

<mosaic_0001>
module attributes {stable_mosaic.version = 11 : i64} {
  func.func @_sscritic_kernel(%arg0: i32, %arg1: memref<2x1024xf32, #tpu.memory_space<vmem>>, %arg2: memref<2x2xf32, #tpu.memory_space<vmem>>, %arg3: memref<1024x512xbf16, #tpu.memory_space<vmem>>, %arg4: memref<1x512xf32, #tpu.memory_space<vmem>>, %arg5: memref<512x256xbf16, #tpu.memory_space<vmem>>, %arg6: memref<1x256xf32, #tpu.memory_space<vmem>>, %arg7: memref<256x32xbf16, #tpu.memory_space<vmem>>, %arg8: memref<1x32xf32, #tpu.memory_space<vmem>>, %arg9: memref<32x32xbf16, #tpu.memory_space<vmem>>, %arg10: memref<2x32xf32, #tpu.memory_space<vmem>>, %arg11: memref<1x32xf32, #tpu.memory_space<vmem>>, %arg12: memref<1x32xf32, #tpu.memory_space<vmem>>, %arg13: memref<1x1xf32, #tpu.memory_space<vmem>>, %arg14: memref<2x1xf32, #tpu.memory_space<vmem>>) attributes {dimension_semantics = [#tpu.dimension_semantics<parallel>], iteration_bounds = array<i64: 1>, scalar_prefetch = 0 : i64, scratch_operands = 0 : i64, tpu.core_type = #tpu.core_type<tc>, window_params = [{transform_indices = @transform_0, window_bounds = array<i64: 2, 1024>}, {transform_indices = @transform_1, window_bounds = array<i64: 2, 2>}, {pipeline_mode = #tpu.pipeline_mode<synchronous>, transform_indices = @transform_2, window_bounds = array<i64: 1024, 512>}, {pipeline_mode = #tpu.pipeline_mode<synchronous>, transform_indices = @transform_3, window_bounds = array<i64: 1, 512>}, {pipeline_mode = #tpu.pipeline_mode<synchronous>, transform_indices = @transform_4, window_bounds = array<i64: 512, 256>}, {pipeline_mode = #tpu.pipeline_mode<synchronous>, transform_indices = @transform_5, window_bounds = array<i64: 1, 256>}, {pipeline_mode = #tpu.pipeline_mode<synchronous>, transform_indices = @transform_6, window_bounds = array<i64: 256, 32>}, {pipeline_mode = #tpu.pipeline_mode<synchronous>, transform_indices = @transform_7, window_bounds = array<i64: 1, 32>}, {pipeline_mode = #tpu.pipeline_mode<synchronous>, transform_indices = @transform_8, window_bounds = array<i64: 32, 32>}, {pipeline_mode = #tpu.pipeline_mode<synchronous>, transform_indices = @transform_9, window_bounds = array<i64: 2, 32>}, {pipeline_mode = #tpu.pipeline_mode<synchronous>, transform_indices = @transform_10, window_bounds = array<i64: 1, 32>}, {pipeline_mode = #tpu.pipeline_mode<synchronous>, transform_indices = @transform_11, window_bounds = array<i64: 1, 32>}, {pipeline_mode = #tpu.pipeline_mode<synchronous>, transform_indices = @transform_12, window_bounds = array<i64: 1, 1>}, {transform_indices = @transform_13, window_bounds = array<i64: 2, 1>}]} {
    %c0 = arith.constant 0 : index
    %c0_0 = arith.constant 0 : index
    %0 = vector.load %arg1[%c0, %c0_0] : memref<2x1024xf32, #tpu.memory_space<vmem>>, vector<2x1024xf32>
    %1 = arith.truncf %0 : vector<2x1024xf32> to vector<2x1024xbf16>
    %c0_1 = arith.constant 0 : index
    %c0_2 = arith.constant 0 : index
    %2 = vector.load %arg3[%c0_1, %c0_2] : memref<1024x512xbf16, #tpu.memory_space<vmem>>, vector<1024x512xbf16>
    %cst = arith.constant dense<0.000000e+00> : vector<2x512xf32>
    %3 = tpu.matmul %1, %2, %cst {dimension_numbers = #tpu.dot_dimension_numbers<[1], [0], [0], [1], [0, 0, 1, 1], [], []>} : vector<2x1024xbf16>, vector<1024x512xbf16>, vector<2x512xf32> -> vector<2x512xf32>
    %c0_3 = arith.constant 0 : index
    %c0_4 = arith.constant 0 : index
    %4 = vector.load %arg4[%c0_3, %c0_4] : memref<1x512xf32, #tpu.memory_space<vmem>>, vector<1x512xf32>
    %5 = vector.broadcast %4 : vector<1x512xf32> to vector<2x512xf32>
    %6 = arith.addf %3, %5 : vector<2x512xf32>
    %cst_5 = arith.constant 0.000000e+00 : f32
    %7 = vector.broadcast %cst_5 : f32 to vector<2x512xf32>
    %8 = arith.maximumf %6, %7 : vector<2x512xf32>
    %9 = arith.truncf %8 : vector<2x512xf32> to vector<2x512xbf16>
    %c0_6 = arith.constant 0 : index
    %c0_7 = arith.constant 0 : index
    %10 = vector.load %arg5[%c0_6, %c0_7] : memref<512x256xbf16, #tpu.memory_space<vmem>>, vector<512x256xbf16>
    %cst_8 = arith.constant dense<0.000000e+00> : vector<2x256xf32>
    %11 = tpu.matmul %9, %10, %cst_8 {dimension_numbers = #tpu.dot_dimension_numbers<[1], [0], [0], [1], [0, 0, 1, 1], [], []>} : vector<2x512xbf16>, vector<512x256xbf16>, vector<2x256xf32> -> vector<2x256xf32>
    %c0_9 = arith.constant 0 : index
    %c0_10 = arith.constant 0 : index
    %12 = vector.load %arg6[%c0_9, %c0_10] : memref<1x256xf32, #tpu.memory_space<vmem>>, vector<1x256xf32>
    %13 = vector.broadcast %12 : vector<1x256xf32> to vector<2x256xf32>
    %14 = arith.addf %11, %13 : vector<2x256xf32>
    %cst_11 = arith.constant 0.000000e+00 : f32
    %15 = vector.broadcast %cst_11 : f32 to vector<2x256xf32>
    %16 = arith.maximumf %14, %15 : vector<2x256xf32>
    %17 = arith.truncf %16 : vector<2x256xf32> to vector<2x256xbf16>
    %c0_12 = arith.constant 0 : index
    %c0_13 = arith.constant 0 : index
    %18 = vector.load %arg7[%c0_12, %c0_13] : memref<256x32xbf16, #tpu.memory_space<vmem>>, vector<256x32xbf16>
    %cst_14 = arith.constant dense<0.000000e+00> : vector<2x32xf32>
    %19 = tpu.matmul %17, %18, %cst_14 {dimension_numbers = #tpu.dot_dimension_numbers<[1], [0], [0], [1], [0, 0, 1, 1], [], []>} : vector<2x256xbf16>, vector<256x32xbf16>, vector<2x32xf32> -> vector<2x32xf32>
    %c0_15 = arith.constant 0 : index
    %c0_16 = arith.constant 0 : index
    %20 = vector.load %arg8[%c0_15, %c0_16] : memref<1x32xf32, #tpu.memory_space<vmem>>, vector<1x32xf32>
    %21 = vector.broadcast %20 : vector<1x32xf32> to vector<2x32xf32>
    %22 = arith.addf %19, %21 : vector<2x32xf32>
    %cst_17 = arith.constant 0.000000e+00 : f32
    %23 = vector.broadcast %cst_17 : f32 to vector<2x32xf32>
    %24 = arith.maximumf %22, %23 : vector<2x32xf32>
    %c0_18 = arith.constant 0 : index
    %c0_19 = arith.constant 0 : index
    %25 = vector.load %arg2[%c0_18, %c0_19] : memref<2x2xf32, #tpu.memory_space<vmem>>, vector<2x2xf32>
    %26 = vector.extract_strided_slice %25 {offsets = [0, 0], sizes = [2, 1], strides = [1, 1]} : vector<2x2xf32> to vector<2x1xf32>
    %c0_20 = arith.constant 0 : index
    %c0_21 = arith.constant 0 : index
    %27 = vector.load %arg10[%c0_20, %c0_21] : memref<2x32xf32, #tpu.memory_space<vmem>>, vector<1x32xf32>
    %28 = vector.broadcast %26 : vector<2x1xf32> to vector<2x32xf32>
    %29 = vector.broadcast %27 : vector<1x32xf32> to vector<2x32xf32>
    %30 = arith.mulf %28, %29 : vector<2x32xf32>
    %31 = vector.extract_strided_slice %25 {offsets = [0, 1], sizes = [2, 1], strides = [1, 1]} : vector<2x2xf32> to vector<2x1xf32>
    %c1 = arith.constant 1 : index
    %c0_22 = arith.constant 0 : index
    %32 = vector.load %arg10[%c1, %c0_22] : memref<2x32xf32, #tpu.memory_space<vmem>>, vector<1x32xf32>
    %33 = vector.broadcast %31 : vector<2x1xf32> to vector<2x32xf32>
    %34 = vector.broadcast %32 : vector<1x32xf32> to vector<2x32xf32>
    %35 = arith.mulf %33, %34 : vector<2x32xf32>
    %36 = arith.addf %30, %35 : vector<2x32xf32>
    %37 = arith.truncf %24 : vector<2x32xf32> to vector<2x32xbf16>
    %c0_23 = arith.constant 0 : index
    %c0_24 = arith.constant 0 : index
    %38 = vector.load %arg9[%c0_23, %c0_24] : memref<32x32xbf16, #tpu.memory_space<vmem>>, vector<32x32xbf16>
    %cst_25 = arith.constant dense<0.000000e+00> : vector<2x32xf32>
    %39 = tpu.matmul %37, %38, %cst_25 {dimension_numbers = #tpu.dot_dimension_numbers<[1], [0], [0], [1], [0, 0, 1, 1], [], []>} : vector<2x32xbf16>, vector<32x32xbf16>, vector<2x32xf32> -> vector<2x32xf32>
    %40 = arith.addf %39, %36 : vector<2x32xf32>
    %c0_26 = arith.constant 0 : index
    %c0_27 = arith.constant 0 : index
    %41 = vector.load %arg11[%c0_26, %c0_27] : memref<1x32xf32, #tpu.memory_space<vmem>>, vector<1x32xf32>
    %42 = vector.broadcast %41 : vector<1x32xf32> to vector<2x32xf32>
    %43 = arith.addf %40, %42 : vector<2x32xf32>
    %cst_28 = arith.constant 0.000000e+00 : f32
    %44 = vector.broadcast %cst_28 : f32 to vector<2x32xf32>
    %45 = arith.maximumf %43, %44 : vector<2x32xf32>
    %c0_29 = arith.constant 0 : index
    %c0_30 = arith.constant 0 : index
    %46 = vector.load %arg12[%c0_29, %c0_30] : memref<1x32xf32, #tpu.memory_space<vmem>>, vector<1x32xf32>
    %47 = vector.broadcast %46 : vector<1x32xf32> to vector<2x32xf32>
    %48 = arith.mulf %45, %47 : vector<2x32xf32>
    %cst_31 = arith.constant dense<0.000000e+00> : vector<2xf32>
    %49 = vector.multi_reduction <add>, %48, %cst_31 [1] : vector<2x32xf32> to vector<2xf32>
    %50 = vector.shape_cast %49 : vector<2xf32> to vector<2x1xf32>
    %c0_32 = arith.constant 0 : index
    %c0_33 = arith.constant 0 : index
    %51 = vector.load %arg13[%c0_32, %c0_33] : memref<1x1xf32, #tpu.memory_space<vmem>>, vector<1x1xf32>
    %52 = vector.broadcast %51 : vector<1x1xf32> to vector<2x1xf32>
    %53 = arith.addf %50, %52 : vector<2x1xf32>
    %c0_34 = arith.constant 0 : index
    %c0_35 = arith.constant 0 : index
    %54 = vector.load %arg14[%c0_34, %c0_35] : memref<2x1xf32, #tpu.memory_space<vmem>>, vector<2x1xf32>
    tpu.vector_store %arg14[%c0_34, %c0_35], %53 {strides = array<i32>} : memref<2x1xf32, #tpu.memory_space<vmem>>, vector<2x1xf32>,
    return
  }
  func.func @transform_0(%arg0: i32) -> (i32, i32) {
    %c0_i32 = arith.constant 0 : i32
    %c0_i32_0 = arith.constant 0 : i32
    return %arg0, %c0_i32 : i32, i32
  }
  func.func @transform_1(%arg0: i32) -> (i32, i32) {
    %c0_i32 = arith.constant 0 : i32
    %c0_i32_0 = arith.constant 0 : i32
    return %arg0, %c0_i32 : i32, i32
  }
  func.func @transform_2(%arg0: i32) -> (i32, i32) {
    %c0_i32 = arith.constant 0 : i32
    %c0_i32_0 = arith.constant 0 : i32
    %c0_i32_1 = arith.constant 0 : i32
    return %c0_i32, %c0_i32_0 : i32, i32
  }
  func.func @transform_3(%arg0: i32) -> (i32, i32) {
    %c0_i32 = arith.constant 0 : i32
    %c0_i32_0 = arith.constant 0 : i32
    %c0_i32_1 = arith.constant 0 : i32
    return %c0_i32, %c0_i32_0 : i32, i32
  }
  func.func @transform_4(%arg0: i32) -> (i32, i32) {
    %c0_i32 = arith.constant 0 : i32
    %c0_i32_0 = arith.constant 0 : i32
    %c0_i32_1 = arith.constant 0 : i32
    return %c0_i32, %c0_i32_0 : i32, i32
  }
  func.func @transform_5(%arg0: i32) -> (i32, i32) {
    %c0_i32 = arith.constant 0 : i32
    %c0_i32_0 = arith.constant 0 : i32
    %c0_i32_1 = arith.constant 0 : i32
    return %c0_i32, %c0_i32_0 : i32, i32
  }
  func.func @transform_6(%arg0: i32) -> (i32, i32) {
    %c0_i32 = arith.constant 0 : i32
    %c0_i32_0 = arith.constant 0 : i32
    %c0_i32_1 = arith.constant 0 : i32
    return %c0_i32, %c0_i32_0 : i32, i32
  }
  func.func @transform_7(%arg0: i32) -> (i32, i32) {
    %c0_i32 = arith.constant 0 : i32
    %c0_i32_0 = arith.constant 0 : i32
    %c0_i32_1 = arith.constant 0 : i32
    return %c0_i32, %c0_i32_0 : i32, i32
  }
  func.func @transform_8(%arg0: i32) -> (i32, i32) {
    %c0_i32 = arith.constant 0 : i32
    %c0_i32_0 = arith.constant 0 : i32
    %c0_i32_1 = arith.constant 0 : i32
    return %c0_i32, %c0_i32_0 : i32, i32
  }
  func.func @transform_9(%arg0: i32) -> (i32, i32) {
    %c0_i32 = arith.constant 0 : i32
    %c0_i32_0 = arith.constant 0 : i32
    %c0_i32_1 = arith.constant 0 : i32
    return %c0_i32, %c0_i32_0 : i32, i32
  }
  func.func @transform_10(%arg0: i32) -> (i32, i32) {
    %c0_i32 = arith.constant 0 : i32
    %c0_i32_0 = arith.constant 0 : i32
    %c0_i32_1 = arith.constant 0 : i32
    return %c0_i32, %c0_i32_0 : i32, i32
  }
  func.func @transform_11(%arg0: i32) -> (i32, i32) {
    %c0_i32 = arith.constant 0 : i32
    %c0_i32_0 = arith.constant 0 : i32
    %c0_i32_1 = arith.constant 0 : i32
    return %c0_i32, %c0_i32_0 : i32, i32
  }
  func.func @transform_12(%arg0: i32) -> (i32, i32) {
    %c0_i32 = arith.constant 0 : i32
    %c0_i32_0 = arith.constant 0 : i32
    %c0_i32_1 = arith.constant 0 : i32
    return %c0_i32, %c0_i32_0 : i32, i32
  }
  func.func @transform_13(%arg0: i32) -> (i32, i32) {
    %c0_i32 = arith.constant 0 : i32
    %c0_i32_0 = arith.constant 0 : i32
    return %arg0, %c0_i32 : i32, i32
  }
}

</mosaic_0001>

<bundles_post_ra>
// kernel: sscritic_forward.1
= control target key start
LH: loop header
LB: loop body
LE: loop exit
PB: predicated region body
PF: predicated region fallthrough
CT: control target
= control target key end

     0   :  { %s4040_s0 = inlined_call_operand.vmem [shape: f32[2,1024], index: 0, kind: input, shape index: {}]   ;;  %s4041_s1 = inlined_call_operand.vmem [shape: f32[2,2], index: 1, kind: input, shape index: {}]   ;;  %s4042_s2 = inlined_call_operand.hbm [shape: bf16[1024,512], index: 2, kind: input, shape index: {}]   ;;  %s4043_s3 = inlined_call_operand.vmem [shape: f32[1,512], index: 3, kind: input, shape index: {}]   ;;  %s4044_s4 = inlined_call_operand.hbm [shape: bf16[512,256], index: 4, kind: input, shape index: {}]   ;;  %s4045_s5 = inlined_call_operand.vmem [shape: f32[1,256], index: 5, kind: input, shape index: {}]   ;;  %s4046_s6 = inlined_call_operand.vmem [shape: bf16[256,32], index: 6, kind: input, shape index: {}]   ;;  %s4047_s7 = inlined_call_operand.vmem [shape: f32[1,32], index: 7, kind: input, shape index: {}]   ;;  %s4048_s8 = inlined_call_operand.vmem [shape: bf16[32,32], index: 8, kind: input, shape index: {}]   ;;  %s4049_s9 = inlined_call_operand.vmem [shape: f32[2,32], index: 9, kind: input, shape index: {}]   ;;  %s4050_s10 = inlined_call_operand.vmem [shape: f32[1,32], index: 10, kind: input, shape index: {}]   ;;  %s4051_s11 = inlined_call_operand.vmem [shape: f32[1,32], index: 11, kind: input, shape index: {}]   ;;  %s4052_s12 = inlined_call_operand.<no memory space> [shape: f32[1,1], index: 12, kind: input, shape index: {}]   ;;  %s4053_s13 = inlined_call_operand.vmem [shape: f32[2,1], index: 13, kind: output, shape index: {}]  }
   0x1   :  { %v18_v0 = vstv %s4052_s12 }
   0x2   :  { %19 = vst [vmem:[#allocation2] sm:$0x1] %v18_v0 }
   0x3   :  { %20 = vsyncpa [#allocation4], 0 }
   0x4   :  { %21 = vsyncpa [#allocation6], 0  ;;  %s3773_s27 = smov [#allocation3]   ;;  %s3725_s14 = scalar_lea.hbm %s4042_s2, 32768 }
   0x5   :  { %s31_s28 = sshll.u32 %s3773_s27, 4  ;;  %p3726_p0 = scmp.ne.s32.totalorder %s4042_s2, %s3725_s14  ;;  %s32_s28 = int_to_ptr.vmem [resolvable:$true] %s31_s28 }
   0x6   :  { %p3729_p1 = scmp.lt.u32.totalorder %s3725_s14, %s4042_s2 }
   0x8   :  { %p3731_p2 = pnand %p3729_p1, %p3726_p0 }
   0xa   :  { %3734 = shalt.err (!%p3731_p2)
}
   0xb   :  { %s3735_s12 = scalar_lea.vmem %s32_s28, 32768  ;;  %p3740_p4 = scmp.lt.s32.totalorder %s32_s28, %s32_s28 }
   0xc   :  { %p3736_p3 = scmp.ne.s32.totalorder %s32_s28, %s3735_s12  ;;  %p3741_p5 = scmp.lt.s32.totalorder %s3735_s12, %s3735_s12 }
   0xe   :  { %p3742_p6 = por %p3741_p5, %p3740_p4 }
  0x10   :  { %p3743_p7 = pnand %p3742_p6, %p3736_p3 }
  0x12   :  { %3746 = shalt.err (!%p3743_p7)
}
  0x13   :  { %s3774_s19 = smov 256   ;;  %s3775_s20 = smov 16  }
  0x14   :  { %37 = dma.hbm_to_vmem [thread:$0]  %s4042_s2, 32768, %s32_s28, [#allocation4], %s3774_s19, %s3774_s19, %s3775_s20  }
  0x15   :  { %s3776_s23 = smov [#allocation5]   ;;  %s3747_s27 = scalar_lea.hbm %s4044_s4, 8192 }
  0x16   :  { %s45_s24 = sshll.u32 %s3776_s23, 4  ;;  %p3748_p8 = scmp.ne.s32.totalorder %s4044_s4, %s3747_s27  ;;  %s46_s24 = int_to_ptr.vmem [resolvable:$true] %s45_s24 }
  0x17   :  { %p3751_p9 = scmp.lt.u32.totalorder %s3747_s27, %s4044_s4 }
  0x19   :  { %p3753_p10 = pnand %p3751_p9, %p3748_p8 }
  0x1b   :  { %3756 = shalt.err (!%p3753_p10)
}
  0x1c   :  { %s3757_s16 = scalar_lea.vmem %s46_s24, 8192  ;;  %p3762_p12 = scmp.lt.s32.totalorder %s46_s24, %s46_s24 }
  0x1d   :  { %p3758_p11 = scmp.ne.s32.totalorder %s46_s24, %s3757_s16  ;;  %p3763_p13 = scmp.lt.s32.totalorder %s3757_s16, %s3757_s16 }
  0x1f   :  { %p3764_p0 = por %p3763_p13, %p3762_p12 }
  0x21   :  { %p3765_p1 = pnand %p3764_p0, %p3758_p11 }
  0x23   :  { %3768 = shalt.err (!%p3765_p1)
}
  0x24   :  { %s3777_s2 = smov 128   ;;  %s3778_s28 = smov 8  }
  0x25   :  { %51 = dma.hbm_to_vmem [thread:$0]  %s4044_s4, 8192, %s46_s24, [#allocation6], %s3777_s2, %s3777_s2, %s3778_s28  }
  0x26   :  { %3769 = dma.done.wait [#allocation4], 32768  }
  0x27   :  { %3770 = vsyncadd [#allocation4], 4294934528 }
  0x28   :  { %3771 = dma.done.wait [#allocation6], 8192  }
  0x29   :  { %3772 = vsyncadd [#allocation6], 4294959104  ;;  %v3225_v1 = vld [vmem:[#allocation3 + $0x4] ss:$16 sps:$4 sm:$0xff]   ;;  %v3229_v3 = vld [vmem:[#allocation3] ss:$16 sps:$4 sm:$0xff]   ;;  %v83_v39 = vlaneseq }
  0x2a   :  { %v3227_v2 = vld [vmem:[#allocation3 + $0x204] ss:$16 sps:$4 sm:$0xff]   ;;  %1687 = vmatprep.subr.bf16.mxu1 %v3225_v1  ;;  %v3230_v4 = vld [vmem:[#allocation3 + $0x200] ss:$16 sps:$4 sm:$0xff]   ;;  %v3779_v37 = vmov 1983009808  }
  0x2b   :  { %1728 = vmatprep.subr.bf16.mxu0 %v3227_v2  ;;  %v3231_v5 = vld [vmem:[#allocation3 + $0x24] ss:$16 sps:$4 sm:$0xff]   ;;  %1688 = vmatpush1.bf16.msra.mxu1 %v3229_v3  ;;  %v3235_v7 = vld [vmem:[#allocation3 + $0x20] ss:$16 sps:$4 sm:$0xff]   ;;  %v81_v38 = vunpack.c.l.s4 %v3779_v37  ;;  %v3881_v44 = vshrl.u32 %v83_v39, 7  ;;  %vm3781_vm0 = vmmov 0  }
  0x2c   :  { %1729 = vmatpush1.bf16.msra.mxu0 %v3230_v4  ;;  %v3233_v6 = vld [vmem:[#allocation3 + $0x224] ss:$16 sps:$4 sm:$0xff]   ;;  %1689 = vmatprep.subr.bf16.mxu1 %v3231_v5  ;;  %v3236_v8 = vld [vmem:[#allocation3 + $0x220] ss:$16 sps:$4 sm:$0xff]   ;;  %vm2721_vm1 = vcmask 261120   ;;  %vm2782_vm2 = vcmask 254976  }
  0x2d   :  { %1730 = vmatprep.subr.bf16.mxu0 %v3233_v6  ;;  %v3237_v9 = vld [vmem:[#allocation3 + $0x44] ss:$16 sps:$4 sm:$0xff]   ;;  %v3241_v11 = vld [vmem:[#allocation3 + $0x40] ss:$16 sps:$4 sm:$0xff]   ;;  %v82_v43 = vunpack.c.0.s8 %v81_v38  ;;  %v3357_v38 = vld [vmem:[#allocation3 + $0xac] ss:$16 sps:$4 sm:$0xff]  }
  0x2e   :  { %v3239_v10 = vld [vmem:[#allocation3 + $0x244] ss:$16 sps:$4 sm:$0xff]   ;;  %v3242_v12 = vld [vmem:[#allocation3 + $0x240] ss:$16 sps:$4 sm:$0xff]   ;;  %vm2794_vm3 = vcmask 1024  }
  0x2f   :  { %1690 = vmatpush1.bf16.msra.mxu1 %v3235_v7  ;;  %v3243_v13 = vld [vmem:[#allocation3 + $0x64] ss:$16 sps:$4 sm:$0xff]   ;;  %v3247_v15 = vld [vmem:[#allocation3 + $0x60] ss:$16 sps:$4 sm:$0xff]   ;;  %v3884_v50 = vsub.s32 %v82_v43, %v3881_v44 }
  0x30   :  { %1731 = vmatpush1.bf16.msra.mxu0 %v3236_v8  ;;  %1691 = vmatprep.subr.bf16.mxu1 %v3237_v9  ;;  %v3245_v14 = vld [vmem:[#allocation3 + $0x264] ss:$16 sps:$4 sm:$0xff]   ;;  %v3248_v16 = vld [vmem:[#allocation3 + $0x260] ss:$16 sps:$4 sm:$0xff]  }
  0x31   :  { %1732 = vmatprep.subr.bf16.mxu0 %v3239_v10  ;;  %v3249_v17 = vld [vmem:[#allocation3 + $0x84] ss:$16 sps:$4 sm:$0xff]   ;;  %v3253_v19 = vld [vmem:[#allocation3 + $0x80] ss:$16 sps:$4 sm:$0xff]  }
  0x32   :  { %v3251_v18 = vld [vmem:[#allocation3 + $0x284] ss:$16 sps:$4 sm:$0xff]   ;;  %v3254_v20 = vld [vmem:[#allocation3 + $0x280] ss:$16 sps:$4 sm:$0xff]  }
  0x33   :  { %1692 = vmatpush1.bf16.msra.mxu1 %v3241_v11  ;;  %v3255_v21 = vld [vmem:[#allocation3 + $0xa4] ss:$16 sps:$4 sm:$0xff]   ;;  %v3259_v23 = vld [vmem:[#allocation3 + $0xa0] ss:$16 sps:$4 sm:$0xff]  }
  0x34   :  { %1733 = vmatpush1.bf16.msra.mxu0 %v3242_v12  ;;  %1693 = vmatprep.subr.bf16.mxu1 %v3243_v13  ;;  %v3257_v22 = vld [vmem:[#allocation3 + $0x2a4] ss:$16 sps:$4 sm:$0xff]   ;;  %v3260_v24 = vld [vmem:[#allocation3 + $0x2a0] ss:$16 sps:$4 sm:$0xff]  }
  0x35   :  { %1734 = vmatprep.subr.bf16.mxu0 %v3245_v14  ;;  %v3261_v25 = vld [vmem:[#allocation3 + $0xc4] ss:$16 sps:$4 sm:$0xff]   ;;  %v3265_v27 = vld [vmem:[#allocation3 + $0xc0] ss:$16 sps:$4 sm:$0xff]  }
  0x36   :  { %v3263_v26 = vld [vmem:[#allocation3 + $0x2c4] ss:$16 sps:$4 sm:$0xff]   ;;  %v3266_v28 = vld [vmem:[#allocation3 + $0x2c0] ss:$16 sps:$4 sm:$0xff]  }
  0x37   :  { %1694 = vmatpush1.bf16.msra.mxu1 %v3247_v15  ;;  %v3267_v29 = vld [vmem:[#allocation3 + $0xe4] ss:$16 sps:$4 sm:$0xff]   ;;  %v3271_v31 = vld [vmem:[#allocation3 + $0xe0] ss:$16 sps:$4 sm:$0xff]  }
  0x38   :  { %1735 = vmatpush1.bf16.msra.mxu0 %v3248_v16  ;;  %1695 = vmatprep.subr.bf16.mxu1 %v3249_v17  ;;  %v3269_v30 = vld [vmem:[#allocation3 + $0x2e4] ss:$16 sps:$4 sm:$0xff]   ;;  %v3272_v32 = vld [vmem:[#allocation3 + $0x2e0] ss:$16 sps:$4 sm:$0xff]   ;;  %v3327_v16 = vld [vmem:[#allocation3 + $0xc] ss:$16 sps:$4 sm:$0xff]  }
  0x39   :  { %1736 = vmatprep.subr.bf16.mxu0 %v3251_v18  ;;  %v3273_v33 = vld [vmem:[#allocation3 + $0x104] ss:$16 sps:$4 sm:$0xff]   ;;  %v3277_v35 = vld [vmem:[#allocation3 + $0x100] ss:$16 sps:$4 sm:$0xff]  }
  0x3a   :  { %v3275_v34 = vld [vmem:[#allocation3 + $0x304] ss:$16 sps:$4 sm:$0xff]   ;;  %v3278_v36 = vld [vmem:[#allocation3 + $0x300] ss:$16 sps:$4 sm:$0xff]  }
  0x3b   :  { %1696 = vmatpush1.bf16.msra.mxu1 %v3253_v19  ;;  %v3279_v40 = vld [vmem:[#allocation3 + $0x124] ss:$16 sps:$4 sm:$0xff]   ;;  %v3283_v42 = vld [vmem:[#allocation3 + $0x120] ss:$16 sps:$4 sm:$0xff]  }
  0x3c   :  { %1737 = vmatpush1.bf16.msra.mxu0 %v3254_v20  ;;  %1697 = vmatprep.subr.bf16.mxu1 %v3255_v21  ;;  %v3281_v41 = vld [vmem:[#allocation3 + $0x324] ss:$16 sps:$4 sm:$0xff]   ;;  %v3284_v45 = vld [vmem:[#allocation3 + $0x320] ss:$16 sps:$4 sm:$0xff]   ;;  %v3325_v20 = vld [vmem:[#allocation3 + $0x8] ss:$16 sps:$4 sm:$0xff]  }
  0x3d   :  { %1738 = vmatprep.subr.bf16.mxu0 %v3257_v22  ;;  %v3285_v46 = vld [vmem:[#allocation3 + $0x144] ss:$16 sps:$4 sm:$0xff]   ;;  %v3289_v48 = vld [vmem:[#allocation3 + $0x140] ss:$16 sps:$4 sm:$0xff]   ;;  %v3333_v22 = vld [vmem:[#allocation3 + $0x2c] ss:$16 sps:$4 sm:$0xff]  }
  0x3e   :  { %v3287_v47 = vld [vmem:[#allocation3 + $0x344] ss:$16 sps:$4 sm:$0xff]   ;;  %v3290_v49 = vld [vmem:[#allocation3 + $0x340] ss:$16 sps:$4 sm:$0xff]  }
  0x3f   :  { %1698 = vmatpush1.bf16.msra.mxu1 %v3259_v23  ;;  %v3291_v51 = vld [vmem:[#allocation3 + $0x164] ss:$16 sps:$4 sm:$0xff]   ;;  %v3295_v54 = vld [vmem:[#allocation3 + $0x160] ss:$16 sps:$4 sm:$0xff]  }
  0x40   :  { %1739 = vmatpush1.bf16.msra.mxu0 %v3260_v24  ;;  %1699 = vmatprep.subr.bf16.mxu1 %v3261_v25  ;;  %v3293_v52 = vld [vmem:[#allocation3 + $0x364] ss:$16 sps:$4 sm:$0xff]   ;;  %v3296_v57 = vld [vmem:[#allocation3 + $0x360] ss:$16 sps:$4 sm:$0xff]   ;;  %v3331_v24 = vld [vmem:[#allocation3 + $0x28] ss:$16 sps:$4 sm:$0xff]  }
  0x41   :  { %1740 = vmatprep.subr.bf16.mxu0 %v3263_v26  ;;  %v75_v53 = vld [vmem:[%s4040_s0] sm:$0xff]  ;;  %v3903_v43 = vld [vmem:[%s4040_s0 + $0x8] sm:$0xff] }
  0x42   :  { %v86_v55 = vrot.slane %v75_v53, %v3884_v50  ;;  %v79_v56 = vcombine.high %v75_v53, %v75_v53  ;;  %v3297_v58 = vld [vmem:[#allocation3 + $0x184] ss:$16 sps:$4 sm:$0xff]   ;;  %v3301_v62 = vld [vmem:[#allocation3 + $0x180] ss:$16 sps:$4 sm:$0xff]   ;;  %v3339_v26 = vld [vmem:[#allocation3 + $0x4c] ss:$16 sps:$4 sm:$0xff]  }
  0x43   :  { %1700 = vmatpush1.bf16.msra.mxu1 %v3265_v27  ;;  %v3299_v59 = vld [vmem:[#allocation3 + $0x384] ss:$16 sps:$4 sm:$0xff]   ;;  %v3302_v1 = vld [vmem:[#allocation3 + $0x380] ss:$16 sps:$4 sm:$0xff]  }
  0x44   :  { %1741 = vmatpush1.bf16.msra.mxu0 %v3266_v28  ;;  %1701 = vmatprep.subr.bf16.mxu1 %v3267_v29  ;;  %v94_v60 = vcombine.high %v86_v55, %v86_v55  ;;  %v93_v61 = vrot.slane %v79_v56, %v3884_v50  ;;  %v3303_v2 = vld [vmem:[#allocation3 + $0x1a4] ss:$16 sps:$4 sm:$0xff]   ;;  %v3307_v5 = vld [vmem:[#allocation3 + $0x1a0] ss:$16 sps:$4 sm:$0xff]   ;;  %v3894_v17 = vpack.c.bf16 %v86_v55, %v86_v55  ;;  %v3337_v28 = vld [vmem:[#allocation3 + $0x48] ss:$16 sps:$4 sm:$0xff]  }
  0x45   :  { %1742 = vmatprep.subr.bf16.mxu0 %v3269_v30  ;;  %v3305_v3 = vld [vmem:[#allocation3 + $0x3a4] ss:$16 sps:$4 sm:$0xff]   ;;  %v3308_v6 = vld [vmem:[#allocation3 + $0x3a0] ss:$16 sps:$4 sm:$0xff]   ;;  %v3345_v30 = vld [vmem:[#allocation3 + $0x6c] ss:$16 sps:$4 sm:$0xff]  }
  0x46   :  { %v122_v63 = vpack.c.bf16 %v94_v60, %v94_v60  ;;  %v95_v0 = vcombine.high %v93_v61, %v93_v61  ;;  %v3309_v7 = vld [vmem:[#allocation3 + $0x1c4] ss:$16 sps:$4 sm:$0xff]   ;;  %v3313_v9 = vld [vmem:[#allocation3 + $0x1c0] ss:$16 sps:$4 sm:$0xff]   ;;  %v3896_v19 = vpack.c.bf16 %v93_v61, %v93_v61  ;;  %v3375_v56 = vld [vmem:[#allocation3 + $0x10c] ss:$16 sps:$4 sm:$0xff]  }
  0x47   :  { %1702 = vmatpush1.bf16.msra.mxu1 %v3271_v31  ;;  %v3311_v8 = vld [vmem:[#allocation3 + $0x3c4] ss:$16 sps:$4 sm:$0xff]   ;;  %v3314_v10 = vld [vmem:[#allocation3 + $0x3c0] ss:$16 sps:$4 sm:$0xff]   ;;  %v3381_v60 = vld [vmem:[#allocation3 + $0x12c] ss:$16 sps:$4 sm:$0xff]  }
  0x48   :  { %1743 = vmatpush1.bf16.msra.mxu0 %v3272_v32  ;;  %1703 = vmatprep.subr.bf16.mxu1 %v3273_v33  ;;  %v3891_v4 = vpack.c.bf16 %v95_v0, %v95_v0  ;;  %v3315_v11 = vld [vmem:[#allocation3 + $0x1e4] ss:$16 sps:$4 sm:$0xff]   ;;  %v3319_v13 = vld [vmem:[#allocation3 + $0x1e0] ss:$16 sps:$4 sm:$0xff]   ;;  %v3343_v32 = vld [vmem:[#allocation3 + $0x68] ss:$16 sps:$4 sm:$0xff]  }
  0x49   :  { %1744 = vmatprep.subr.bf16.mxu0 %v3275_v34  ;;  %1719 = vmatprep.mubr.bf16.mxu1 %v122_v63  ;;  %v3317_v12 = vld [vmem:[#allocation3 + $0x3e4] ss:$16 sps:$4 sm:$0xff]   ;;  %v3320_v14 = vld [vmem:[#allocation3 + $0x3e0] ss:$16 sps:$4 sm:$0xff]   ;;  %v3351_v34 = vld [vmem:[#allocation3 + $0x8c] ss:$16 sps:$4 sm:$0xff]  }
  0x4a   :  { %1760 = vmatprep.mubr.bf16.mxu0 %v3891_v4  ;;  %v3324_v15 = vld [vmem:[#allocation3 + $0x404] ss:$16 sps:$4 sm:$0xff]   ;;  %v3322_v18 = vld [vmem:[#allocation3 + $0x400] ss:$16 sps:$4 sm:$0xff]   ;;  %v3387_v0 = vld [vmem:[#allocation3 + $0x14c] ss:$16 sps:$4 sm:$0xff]  }
  0x4b   :  { %1704 = vmatpush1.bf16.msra.mxu1 %v3277_v35  ;;  %v3330_v21 = vld [vmem:[#allocation3 + $0x424] ss:$16 sps:$4 sm:$0xff]   ;;  %v3328_v23 = vld [vmem:[#allocation3 + $0x420] ss:$16 sps:$4 sm:$0xff]  }
  0x4c   :  { %1745 = vmatpush1.bf16.msra.mxu0 %v3278_v36  ;;  %1705 = vmatprep.subr.bf16.mxu1 %v3279_v40  ;;  %v3336_v25 = vld [vmem:[#allocation3 + $0x444] ss:$16 sps:$4 sm:$0xff]   ;;  %v3334_v27 = vld [vmem:[#allocation3 + $0x440] ss:$16 sps:$4 sm:$0xff]   ;;  %v3349_v36 = vld [vmem:[#allocation3 + $0x88] ss:$16 sps:$4 sm:$0xff]  }
  0x4d   :  { %1746 = vmatprep.subr.bf16.mxu0 %v3281_v41  ;;  %v3342_v29 = vld [vmem:[#allocation3 + $0x464] ss:$16 sps:$4 sm:$0xff]   ;;  %v3340_v31 = vld [vmem:[#allocation3 + $0x460] ss:$16 sps:$4 sm:$0xff]   ;;  %v3355_v40 = vld [vmem:[#allocation3 + $0xa8] ss:$16 sps:$4 sm:$0xff]  }
  0x4e   :  { %v3348_v33 = vld [vmem:[#allocation3 + $0x484] ss:$16 sps:$4 sm:$0xff]   ;;  %v3346_v35 = vld [vmem:[#allocation3 + $0x480] ss:$16 sps:$4 sm:$0xff]  }
  0x4f   :  { %1706 = vmatpush1.bf16.msra.mxu1 %v3283_v42  ;;  %v3354_v37 = vld [vmem:[#allocation3 + $0x4a4] ss:$16 sps:$4 sm:$0xff]   ;;  %v3352_v39 = vld [vmem:[#allocation3 + $0x4a0] ss:$16 sps:$4 sm:$0xff]   ;;  %v3363_v42 = vld [vmem:[#allocation3 + $0xcc] ss:$16 sps:$4 sm:$0xff]  }
  0x50   :  { %1747 = vmatpush1.bf16.msra.mxu0 %v3284_v45  ;;  %1707 = vmatprep.subr.bf16.mxu1 %v3285_v46  ;;  %v3360_v41 = vld [vmem:[#allocation3 + $0x4c4] ss:$16 sps:$4 sm:$0xff]   ;;  %v3907_v45 = vrot.slane %v3903_v43, %v3884_v50  ;;  %v3358_v46 = vld [vmem:[#allocation3 + $0x4c0] ss:$16 sps:$4 sm:$0xff]  }
  0x51   :  { %1748 = vmatprep.subr.bf16.mxu0 %v3287_v47  ;;  %v3361_v47 = vld [vmem:[#allocation3 + $0xc8] ss:$16 sps:$4 sm:$0xff]   ;;  %v3364_v53 = vld [vmem:[#allocation3 + $0x4e0] ss:$16 sps:$4 sm:$0xff]   ;;  %v3372_v55 = vld [vmem:[#allocation3 + $0x504] ss:$16 sps:$4 sm:$0xff]  }
  0x52   :  { %v3376_v61 = vld [vmem:[#allocation3 + $0x520] ss:$16 sps:$4 sm:$0xff]  }
  0x53   :  { %1708 = vmatpush1.bf16.msra.mxu1 %v3289_v48  ;;  %v111_v48 = vcombine.high %v3907_v45, %v3907_v45 }
  0x54   :  { %1749 = vmatpush1.bf16.msra.mxu0 %v3290_v49  ;;  %1709 = vmatprep.subr.bf16.mxu1 %v3291_v51  ;;  %v3366_v49 = vld [vmem:[#allocation3 + $0x4e4] ss:$16 sps:$4 sm:$0xff]   ;;  %v3369_v51 = vld [vmem:[#allocation3 + $0xec] ss:$16 sps:$4 sm:$0xff]  }
  0x55   :  { %1750 = vmatprep.subr.bf16.mxu0 %v3293_v52  ;;  %v3911_v52 = vpack.c.bf16 %v111_v48, %v111_v48  ;;  %v3442_v48 = vld [vmem:[#allocation3 + $0x680] ss:$16 sps:$4 sm:$0xff]  }
  0x57   :  { %1710 = vmatpush1.bf16.msra.mxu1 %v3295_v54  ;;  %v3367_v54 = vld [vmem:[#allocation3 + $0xe8] ss:$16 sps:$4 sm:$0xff]  }
  0x58   :  { %1751 = vmatpush1.bf16.msra.mxu0 %v3296_v57  ;;  %1711 = vmatprep.subr.bf16.mxu1 %v3297_v58  ;;  %v3370_v57 = vld [vmem:[#allocation3 + $0x500] ss:$16 sps:$4 sm:$0xff]   ;;  %v3373_v58 = vld [vmem:[#allocation3 + $0x108] ss:$16 sps:$4 sm:$0xff]  }
  0x59   :  { %1752 = vmatprep.subr.bf16.mxu0 %v3299_v59  ;;  %v3378_v59 = vld [vmem:[#allocation3 + $0x524] ss:$16 sps:$4 sm:$0xff]  }
  0x5b   :  { %1712 = vmatpush1.bf16.msra.mxu1 %v3301_v62  ;;  %v3379_v62 = vld [vmem:[#allocation3 + $0x128] ss:$16 sps:$4 sm:$0xff]  }
  0x5c   :  { %1753 = vmatpush1.bf16.msra.mxu0 %v3302_v1  ;;  %1713 = vmatprep.subr.bf16.mxu1 %v3303_v2  ;;  %v3382_v1 = vld [vmem:[#allocation3 + $0x540] ss:$16 sps:$4 sm:$0xff]   ;;  %v3385_v2 = vld [vmem:[#allocation3 + $0x148] ss:$16 sps:$4 sm:$0xff]  }
  0x5d   :  { %1754 = vmatprep.subr.bf16.mxu0 %v3305_v3  ;;  %v3390_v3 = vld [vmem:[#allocation3 + $0x564] ss:$16 sps:$4 sm:$0xff]  }
  0x5f   :  { %1714 = vmatpush1.bf16.msra.mxu1 %v3307_v5  ;;  %v3393_v5 = vld [vmem:[#allocation3 + $0x16c] ss:$16 sps:$4 sm:$0xff]  }
  0x60   :  { %1755 = vmatpush1.bf16.msra.mxu0 %v3308_v6  ;;  %1715 = vmatprep.subr.bf16.mxu1 %v3309_v7  ;;  %v3388_v6 = vld [vmem:[#allocation3 + $0x560] ss:$16 sps:$4 sm:$0xff]   ;;  %v3391_v7 = vld [vmem:[#allocation3 + $0x168] ss:$16 sps:$4 sm:$0xff]  }
  0x61   :  { %1756 = vmatprep.subr.bf16.mxu0 %v3311_v8  ;;  %v3396_v8 = vld [vmem:[#allocation3 + $0x584] ss:$16 sps:$4 sm:$0xff]  }
  0x63   :  { %1716 = vmatpush1.bf16.msra.mxu1 %v3313_v9  ;;  %v3399_v9 = vld [vmem:[#allocation3 + $0x18c] ss:$16 sps:$4 sm:$0xff]  }
  0x64   :  { %1757 = vmatpush1.bf16.msra.mxu0 %v3314_v10  ;;  %1717 = vmatprep.subr.bf16.mxu1 %v3315_v11  ;;  %v3394_v10 = vld [vmem:[#allocation3 + $0x580] ss:$16 sps:$4 sm:$0xff]   ;;  %v3397_v11 = vld [vmem:[#allocation3 + $0x188] ss:$16 sps:$4 sm:$0xff]  }
  0x65   :  { %1758 = vmatprep.subr.bf16.mxu0 %v3317_v12  ;;  %v3402_v12 = vld [vmem:[#allocation3 + $0x5a4] ss:$16 sps:$4 sm:$0xff]  }
  0x67   :  { %1718 = vmatpush1.bf16.msra.mxu1 %v3319_v13  ;;  %v3405_v13 = vld [vmem:[#allocation3 + $0x1ac] ss:$16 sps:$4 sm:$0xff]  }
  0x68   :  { %1759 = vmatpush1.bf16.msra.mxu0 %v3320_v14  ;;  %1851 = vmatprep.subr.bf16.mxu1 %v3327_v16  ;;  %v3400_v14 = vld [vmem:[#allocation3 + $0x5a0] ss:$16 sps:$4 sm:$0xff]   ;;  %v3408_v16 = vld [vmem:[#allocation3 + $0x5c4] ss:$16 sps:$4 sm:$0xff]  }
  0x69   :  { %1769 = vmatprep.subr.bf16.mxu0 %v3324_v15  ;;  %v3403_v15 = vld [vmem:[#allocation3 + $0x1a8] ss:$16 sps:$4 sm:$0xff]  }
  0x6a   :  { %1720 = vmatmul.mubr.bf16.vlgmr.msra.gmra.mrb[0].mxu1 %v3894_v17 }
  0x6b   :  { %1761 = vmatmul.mubr.bf16.vlgmr.msra.gmra.mrb[0].mxu0 %v3896_v19  ;;  %1852 = vmatpush1.bf16.msra.mxu1 %v3325_v20  ;;  %v96_v20 = vcombine.high %v3903_v43, %v3903_v43  ;;  %v3436_v43 = vld [vmem:[#allocation3 + $0x660] ss:$16 sps:$4 sm:$0xff]  }
  0x6c   :  { %1770 = vmatpush1.bf16.msra.mxu0 %v3322_v18  ;;  %1853 = vmatprep.subr.bf16.mxu1 %v3333_v22  ;;  %v3411_v18 = vld [vmem:[#allocation3 + $0x1cc] ss:$16 sps:$4 sm:$0xff]   ;;  %v3409_v22 = vld [vmem:[#allocation3 + $0x1c8] ss:$16 sps:$4 sm:$0xff]  }
  0x6d   :  { %1771 = vmatprep.subr.bf16.mxu0 %v3330_v21  ;;  %1883 = vmatprep.mubr.bf16.mxu1 %v122_v63  ;;  %v3384_v63 = vld [vmem:[#allocation3 + $0x544] ss:$16 sps:$4 sm:$0xff]   ;;  %v3406_v21 = vld [vmem:[#allocation3 + $0x5c0] ss:$16 sps:$4 sm:$0xff]  }
  0x6e   :  { %1801 = vmatprep.mubr.bf16.mxu0 %v3911_v52 }
  0x6f   :  { %1854 = vmatpush1.bf16.msra.mxu1 %v3331_v24  ;;  %v3417_v24 = vld [vmem:[#allocation3 + $0x1ec] ss:$16 sps:$4 sm:$0xff]  }
  0x70   :  { %1772 = vmatpush1.bf16.msra.mxu0 %v3328_v23  ;;  %1855 = vmatprep.subr.bf16.mxu1 %v3339_v26  ;;  %v3414_v23 = vld [vmem:[#allocation3 + $0x5e4] ss:$16 sps:$4 sm:$0xff]   ;;  %v3412_v26 = vld [vmem:[#allocation3 + $0x5e0] ss:$16 sps:$4 sm:$0xff]  }
  0x71   :  { %1773 = vmatprep.subr.bf16.mxu0 %v3336_v25  ;;  %v3917_v25 = vrot.slane %v96_v20, %v3884_v50  ;;  %v3421_v50 = vld [vmem:[#allocation3 + $0x208] ss:$16 sps:$4 sm:$0xff]   ;;  %v3490_v20 = vld [vmem:[#allocation3 + $0x780] ss:$16 sps:$4 sm:$0xff]  }
  0x73   :  { %1856 = vmatpush1.bf16.msra.mxu1 %v3337_v28  ;;  %v3420_v28 = vld [vmem:[#allocation3 + $0x604] ss:$16 sps:$4 sm:$0xff]  }
  0x74   :  { %1774 = vmatpush1.bf16.msra.mxu0 %v3334_v27  ;;  %1857 = vmatprep.subr.bf16.mxu1 %v3345_v30  ;;  %v3415_v27 = vld [vmem:[#allocation3 + $0x1e8] ss:$16 sps:$4 sm:$0xff]   ;;  %v112_v30 = vcombine.high %v3917_v25, %v3917_v25 }
  0x75   :  { %1775 = vmatprep.subr.bf16.mxu0 %v3342_v29  ;;  %v3423_v29 = vld [vmem:[#allocation3 + $0x20c] ss:$16 sps:$4 sm:$0xff]  }
  0x77   :  { %1858 = vmatpush1.bf16.msra.mxu1 %v3343_v32  ;;  %v3418_v32 = vld [vmem:[#allocation3 + $0x600] ss:$16 sps:$4 sm:$0xff]  }
  0x78   :  { %1776 = vmatpush1.bf16.msra.mxu0 %v3340_v31  ;;  %1859 = vmatprep.subr.bf16.mxu1 %v3351_v34  ;;  %v3923_v31 = vpack.c.bf16 %v3907_v45, %v3907_v45  ;;  %v3429_v34 = vld [vmem:[#allocation3 + $0x22c] ss:$16 sps:$4 sm:$0xff]   ;;  %v3439_v45 = vld [vmem:[#allocation3 + $0x268] ss:$16 sps:$4 sm:$0xff]  }
  0x79   :  { %1777 = vmatprep.subr.bf16.mxu0 %v3348_v33  ;;  %v3426_v33 = vld [vmem:[#allocation3 + $0x624] ss:$16 sps:$4 sm:$0xff]  }
  0x7b   :  { %1860 = vmatpush1.bf16.msra.mxu1 %v3349_v36  ;;  %v3424_v36 = vld [vmem:[#allocation3 + $0x620] ss:$16 sps:$4 sm:$0xff]  }
  0x7c   :  { %1778 = vmatpush1.bf16.msra.mxu0 %v3346_v35  ;;  %1861 = vmatprep.subr.bf16.mxu1 %v3357_v38  ;;  %v3925_v35 = vpack.c.bf16 %v112_v30, %v112_v30  ;;  %v3432_v38 = vld [vmem:[#allocation3 + $0x644] ss:$16 sps:$4 sm:$0xff]   ;;  %v3505_v30 = vld [vmem:[#allocation3 + $0x3c8] ss:$16 sps:$4 sm:$0xff]  }
  0x7d   :  { %1779 = vmatprep.subr.bf16.mxu0 %v3354_v37  ;;  %v3427_v37 = vld [vmem:[#allocation3 + $0x228] ss:$16 sps:$4 sm:$0xff]  }
  0x7f   :  { %1862 = vmatpush1.bf16.msra.mxu1 %v3355_v40  ;;  %v3430_v40 = vld [vmem:[#allocation3 + $0x640] ss:$16 sps:$4 sm:$0xff]  }
  0x80   :  { %1780 = vmatpush1.bf16.msra.mxu0 %v3352_v39  ;;  %1863 = vmatprep.subr.bf16.mxu1 %v3363_v42  ;;  %v3435_v39 = vld [vmem:[#allocation3 + $0x24c] ss:$16 sps:$4 sm:$0xff]   ;;  %v3438_v42 = vld [vmem:[#allocation3 + $0x664] ss:$16 sps:$4 sm:$0xff]  }
  0x81   :  { %1781 = vmatprep.subr.bf16.mxu0 %v3360_v41  ;;  %v3433_v41 = vld [vmem:[#allocation3 + $0x248] ss:$16 sps:$4 sm:$0xff]  }
  0x83   :  { %1864 = vmatpush1.bf16.msra.mxu1 %v3361_v47  ;;  %v3447_v47 = vld [vmem:[#allocation3 + $0x28c] ss:$16 sps:$4 sm:$0xff]  }
  0x84   :  { %1782 = vmatpush1.bf16.msra.mxu0 %v3358_v46  ;;  %1865 = vmatprep.subr.bf16.mxu1 %v3369_v51  ;;  %v3444_v46 = vld [vmem:[#allocation3 + $0x684] ss:$16 sps:$4 sm:$0xff]   ;;  %v3453_v51 = vld [vmem:[#allocation3 + $0x2ac] ss:$16 sps:$4 sm:$0xff]  }
  0x85   :  { %1783 = vmatprep.subr.bf16.mxu0 %v3366_v49  ;;  %v3450_v49 = vld [vmem:[#allocation3 + $0x6a4] ss:$16 sps:$4 sm:$0xff]  }
  0x87   :  { %1866 = vmatpush1.bf16.msra.mxu1 %v3367_v54  ;;  %v3451_v54 = vld [vmem:[#allocation3 + $0x2a8] ss:$16 sps:$4 sm:$0xff]  }
  0x88   :  { %1784 = vmatpush1.bf16.msra.mxu0 %v3364_v53  ;;  %1867 = vmatprep.subr.bf16.mxu1 %v3375_v56  ;;  %v3448_v53 = vld [vmem:[#allocation3 + $0x6a0] ss:$16 sps:$4 sm:$0xff]   ;;  %v3459_v56 = vld [vmem:[#allocation3 + $0x2cc] ss:$16 sps:$4 sm:$0xff]  }
  0x89   :  { %1785 = vmatprep.subr.bf16.mxu0 %v3372_v55  ;;  %v3456_v55 = vld [vmem:[#allocation3 + $0x6c4] ss:$16 sps:$4 sm:$0xff]  }
  0x8b   :  { %1868 = vmatpush1.bf16.msra.mxu1 %v3373_v58  ;;  %v3457_v58 = vld [vmem:[#allocation3 + $0x2c8] ss:$16 sps:$4 sm:$0xff]  }
  0x8c   :  { %1786 = vmatpush1.bf16.msra.mxu0 %v3370_v57  ;;  %1869 = vmatprep.subr.bf16.mxu1 %v3381_v60  ;;  %v3454_v57 = vld [vmem:[#allocation3 + $0x6c0] ss:$16 sps:$4 sm:$0xff]   ;;  %v3465_v60 = vld [vmem:[#allocation3 + $0x2ec] ss:$16 sps:$4 sm:$0xff]  }
  0x8d   :  { %1787 = vmatprep.subr.bf16.mxu0 %v3378_v59  ;;  %v3462_v59 = vld [vmem:[#allocation3 + $0x6e4] ss:$16 sps:$4 sm:$0xff]  }
  0x8f   :  { %1870 = vmatpush1.bf16.msra.mxu1 %v3379_v62  ;;  %v3463_v62 = vld [vmem:[#allocation3 + $0x2e8] ss:$16 sps:$4 sm:$0xff]  }
  0x90   :  { %1788 = vmatpush1.bf16.msra.mxu0 %v3376_v61  ;;  %1871 = vmatprep.subr.bf16.mxu1 %v3387_v0  ;;  %v3460_v61 = vld [vmem:[#allocation3 + $0x6e0] ss:$16 sps:$4 sm:$0xff]   ;;  %v3471_v0 = vld [vmem:[#allocation3 + $0x30c] ss:$16 sps:$4 sm:$0xff]  }
  0x91   :  { %1789 = vmatprep.subr.bf16.mxu0 %v3384_v63  ;;  %v3468_v63 = vld [vmem:[#allocation3 + $0x704] ss:$16 sps:$4 sm:$0xff]  }
  0x93   :  { %1872 = vmatpush1.bf16.msra.mxu1 %v3385_v2  ;;  %v3469_v2 = vld [vmem:[#allocation3 + $0x308] ss:$16 sps:$4 sm:$0xff]  }
  0x94   :  { %1790 = vmatpush1.bf16.msra.mxu0 %v3382_v1  ;;  %1873 = vmatprep.subr.bf16.mxu1 %v3393_v5  ;;  %v3466_v1 = vld [vmem:[#allocation3 + $0x700] ss:$16 sps:$4 sm:$0xff]   ;;  %v3477_v5 = vld [vmem:[#allocation3 + $0x32c] ss:$16 sps:$4 sm:$0xff]  }
  0x95   :  { %1791 = vmatprep.subr.bf16.mxu0 %v3390_v3  ;;  %v3474_v3 = vld [vmem:[#allocation3 + $0x724] ss:$16 sps:$4 sm:$0xff]  }
  0x97   :  { %1874 = vmatpush1.bf16.msra.mxu1 %v3391_v7  ;;  %v3475_v7 = vld [vmem:[#allocation3 + $0x328] ss:$16 sps:$4 sm:$0xff]  }
  0x98   :  { %1792 = vmatpush1.bf16.msra.mxu0 %v3388_v6  ;;  %1875 = vmatprep.subr.bf16.mxu1 %v3399_v9  ;;  %v3472_v6 = vld [vmem:[#allocation3 + $0x720] ss:$16 sps:$4 sm:$0xff]   ;;  %v3483_v9 = vld [vmem:[#allocation3 + $0x34c] ss:$16 sps:$4 sm:$0xff]  }
  0x99   :  { %1793 = vmatprep.subr.bf16.mxu0 %v3396_v8  ;;  %v3480_v8 = vld [vmem:[#allocation3 + $0x744] ss:$16 sps:$4 sm:$0xff]  }
  0x9b   :  { %1876 = vmatpush1.bf16.msra.mxu1 %v3397_v11  ;;  %v3481_v11 = vld [vmem:[#allocation3 + $0x348] ss:$16 sps:$4 sm:$0xff]  }
  0x9c   :  { %1794 = vmatpush1.bf16.msra.mxu0 %v3394_v10  ;;  %1877 = vmatprep.subr.bf16.mxu1 %v3405_v13  ;;  %v3478_v10 = vld [vmem:[#allocation3 + $0x740] ss:$16 sps:$4 sm:$0xff]   ;;  %v3489_v13 = vld [vmem:[#allocation3 + $0x36c] ss:$16 sps:$4 sm:$0xff]  }
  0x9d   :  { %1795 = vmatprep.subr.bf16.mxu0 %v3402_v12  ;;  %v3486_v12 = vld [vmem:[#allocation3 + $0x764] ss:$16 sps:$4 sm:$0xff]  }
  0x9f   :  { %1878 = vmatpush1.bf16.msra.mxu1 %v3403_v15  ;;  %v3487_v15 = vld [vmem:[#allocation3 + $0x368] ss:$16 sps:$4 sm:$0xff]  }
  0xa0   :  { %1796 = vmatpush1.bf16.msra.mxu0 %v3400_v14  ;;  %1879 = vmatprep.subr.bf16.mxu1 %v3411_v18  ;;  %v3484_v14 = vld [vmem:[#allocation3 + $0x760] ss:$16 sps:$4 sm:$0xff]   ;;  %v3495_v18 = vld [vmem:[#allocation3 + $0x38c] ss:$16 sps:$4 sm:$0xff]  }
  0xa1   :  { %1797 = vmatprep.subr.bf16.mxu0 %v3408_v16  ;;  %v3492_v16 = vld [vmem:[#allocation3 + $0x784] ss:$16 sps:$4 sm:$0xff]  }
  0xa3   :  { %1880 = vmatpush1.bf16.msra.mxu1 %v3409_v22  ;;  %v3498_v22 = vld [vmem:[#allocation3 + $0x7a4] ss:$16 sps:$4 sm:$0xff]  }
  0xa4   :  { %1798 = vmatpush1.bf16.msra.mxu0 %v3406_v21  ;;  %1881 = vmatprep.subr.bf16.mxu1 %v3417_v24  ;;  %v3493_v21 = vld [vmem:[#allocation3 + $0x388] ss:$16 sps:$4 sm:$0xff]   ;;  %v3496_v24 = vld [vmem:[#allocation3 + $0x7a0] ss:$16 sps:$4 sm:$0xff]  }
  0xa5   :  { %1799 = vmatprep.subr.bf16.mxu0 %v3414_v23  ;;  %v3501_v23 = vld [vmem:[#allocation3 + $0x3ac] ss:$16 sps:$4 sm:$0xff]  }
  0xa7   :  { %1882 = vmatpush1.bf16.msra.mxu1 %v3415_v27  ;;  %v3504_v27 = vld [vmem:[#allocation3 + $0x7c4] ss:$16 sps:$4 sm:$0xff]  }
  0xa8   :  { %1800 = vmatpush1.bf16.msra.mxu0 %v3412_v26  ;;  %1892 = vmatprep.subr.bf16.mxu1 %v3423_v29  ;;  %v3499_v26 = vld [vmem:[#allocation3 + $0x3a8] ss:$16 sps:$4 sm:$0xff]   ;;  %v3502_v29 = vld [vmem:[#allocation3 + $0x7c0] ss:$16 sps:$4 sm:$0xff]  }
  0xa9   :  { %1810 = vmatprep.subr.bf16.mxu0 %v3420_v28  ;;  %v3507_v28 = vld [vmem:[#allocation3 + $0x3cc] ss:$16 sps:$4 sm:$0xff]  }
  0xaa   :  { %1884 = vmatmul.mubr.bf16.vlgmr.msra.gmra.mrb[4].mxu1 %v3894_v17  ;;  %v3441_v17 = vld [vmem:[#allocation3 + $0x26c] ss:$16 sps:$4 sm:$0xff]  }
  0xab   :  { %1802 = vmatmul.mubr.bf16.vlgmr.msra.gmra.mrb[0].mxu0 %v3923_v31  ;;  %1893 = vmatpush1.bf16.msra.mxu1 %v3421_v50  ;;  %v3513_v50 = vld [vmem:[#allocation3 + $0x3ec] ss:$16 sps:$4 sm:$0xff]  }
  0xac   :  { %1811 = vmatpush1.bf16.msra.mxu0 %v3418_v32  ;;  %1894 = vmatprep.subr.bf16.mxu1 %v3429_v34  ;;  %v3510_v32 = vld [vmem:[#allocation3 + $0x7e4] ss:$16 sps:$4 sm:$0xff]   ;;  %v3511_v34 = vld [vmem:[#allocation3 + $0x3e8] ss:$16 sps:$4 sm:$0xff]  }
  0xad   :  { %1812 = vmatprep.subr.bf16.mxu0 %v3426_v33  ;;  %1842 = vmatprep.mubr.bf16.mxu0 %v3925_v35  ;;  %v3508_v33 = vld [vmem:[#allocation3 + $0x7e0] ss:$16 sps:$4 sm:$0xff]  }
  0xae   :  { %1924 = vmatprep.mubr.bf16.mxu1 %v3891_v4  ;;  %v3445_v4 = vld [vmem:[#allocation3 + $0x288] ss:$16 sps:$4 sm:$0xff]  }
  0xaf   :  { %1895 = vmatpush1.bf16.msra.mxu1 %v3427_v37  ;;  %v3515_v37 = vld [vmem:[#allocation3 + $0x408] ss:$16 sps:$4 sm:$0xff]  }
  0xb0   :  { %1813 = vmatpush1.bf16.msra.mxu0 %v3424_v36  ;;  %1896 = vmatprep.subr.bf16.mxu1 %v3435_v39  ;;  %v3517_v36 = vld [vmem:[#allocation3 + $0x40c] ss:$16 sps:$4 sm:$0xff]  }
  0xb1   :  { %1814 = vmatprep.subr.bf16.mxu0 %v3432_v38  ;;  %v3933_v38 = vpack.c.bf16 %v3917_v25, %v3917_v25  ;;  %v3520_v39 = vld [vmem:[#allocation3 + $0x42c] ss:$16 sps:$4 sm:$0xff]   ;;  %v3614_v25 = vld [vmem:[#allocation5 + $0x10] ss:$8 sps:$4 sm:$0xff]  }
  0xb3   :  { %1897 = vmatpush1.bf16.msra.mxu1 %v3433_v41  ;;  %v3613_v41 = vld [vmem:[#allocation5 + $0x4] ss:$8 sps:$4 sm:$0xff]  }
  0xb4   :  { %1815 = vmatpush1.bf16.msra.mxu0 %v3430_v40  ;;  %1898 = vmatprep.subr.bf16.mxu1 %v3441_v17  ;;  %v3611_v40 = vld [vmem:[#allocation5] ss:$8 sps:$4 sm:$0xff]   ;;  %v3616_v17 = vld [vmem:[#allocation5 + $0x14] ss:$8 sps:$4 sm:$0xff]  }
  0xb5   :  { %1816 = vmatprep.subr.bf16.mxu0 %v3438_v42  ;;  %v3518_v42 = vld [vmem:[#allocation3 + $0x428] ss:$16 sps:$4 sm:$0xff]  }
  0xb7   :  { %1899 = vmatpush1.bf16.msra.mxu1 %v3439_v45  ;;  %v3619_v45 = vld [vmem:[#allocation5 + $0x24] ss:$8 sps:$4 sm:$0xff]  }
  0xb8   :  { %1817 = vmatpush1.bf16.msra.mxu0 %v3436_v43  ;;  %1900 = vmatprep.subr.bf16.mxu1 %v3447_v47  ;;  %v3523_v43 = vld [vmem:[#allocation3 + $0x44c] ss:$16 sps:$4 sm:$0xff]  }
  0xb9   :  { %1818 = vmatprep.subr.bf16.mxu0 %v3444_v46  ;;  %v3521_v46 = vld [vmem:[#allocation3 + $0x448] ss:$16 sps:$4 sm:$0xff]   ;;  %v3526_v47 = vld [vmem:[#allocation3 + $0x46c] ss:$16 sps:$4 sm:$0xff]  }
  0xbb   :  { %1901 = vmatpush1.bf16.msra.mxu1 %v3445_v4  ;;  %v3529_v4 = vld [vmem:[#allocation3 + $0x48c] ss:$16 sps:$4 sm:$0xff]  }
  0xbc   :  { %1819 = vmatpush1.bf16.msra.mxu0 %v3442_v48  ;;  %1902 = vmatprep.subr.bf16.mxu1 %v3453_v51  ;;  %v3524_v48 = vld [vmem:[#allocation3 + $0x468] ss:$16 sps:$4 sm:$0xff]   ;;  %v3625_v51 = vld [vmem:[#allocation5 + $0x44] ss:$8 sps:$4 sm:$0xff]  }
  0xbd   :  { %1820 = vmatprep.subr.bf16.mxu0 %v3450_v49  ;;  %v3622_v49 = vld [vmem:[#allocation5 + $0x34] ss:$8 sps:$4 sm:$0xff]  }
  0xbf   :  { %1903 = vmatpush1.bf16.msra.mxu1 %v3451_v54  ;;  %v3532_v54 = vld [vmem:[#allocation3 + $0x4ac] ss:$16 sps:$4 sm:$0xff]  }
  0xc0   :  { %1821 = vmatpush1.bf16.msra.mxu0 %v3448_v53  ;;  %1904 = vmatprep.subr.bf16.mxu1 %v3459_v56  ;;  %v3527_v53 = vld [vmem:[#allocation3 + $0x488] ss:$16 sps:$4 sm:$0xff]   ;;  %v3628_v56 = vld [vmem:[#allocation5 + $0x54] ss:$8 sps:$4 sm:$0xff]  }
  0xc1   :  { %1822 = vmatprep.subr.bf16.mxu0 %v3456_v55  ;;  %v3623_v55 = vld [vmem:[#allocation5 + $0x40] ss:$8 sps:$4 sm:$0xff]  }
  0xc3   :  { %1905 = vmatpush1.bf16.msra.mxu1 %v3457_v58  ;;  %v3535_v58 = vld [vmem:[#allocation3 + $0x4cc] ss:$16 sps:$4 sm:$0xff]  }
  0xc4   :  { %1823 = vmatpush1.bf16.msra.mxu0 %v3454_v57  ;;  %1906 = vmatprep.subr.bf16.mxu1 %v3465_v60  ;;  %v3530_v57 = vld [vmem:[#allocation3 + $0x4a8] ss:$16 sps:$4 sm:$0xff]   ;;  %v3631_v60 = vld [vmem:[#allocation5 + $0x64] ss:$8 sps:$4 sm:$0xff]  }
  0xc5   :  { %1824 = vmatprep.subr.bf16.mxu0 %v3462_v59  ;;  %v3626_v59 = vld [vmem:[#allocation5 + $0x50] ss:$8 sps:$4 sm:$0xff]  }
  0xc7   :  { %1907 = vmatpush1.bf16.msra.mxu1 %v3463_v62  ;;  %v3538_v62 = vld [vmem:[#allocation3 + $0x4ec] ss:$16 sps:$4 sm:$0xff]  }
  0xc8   :  { %1825 = vmatpush1.bf16.msra.mxu0 %v3460_v61  ;;  %1908 = vmatprep.subr.bf16.mxu1 %v3471_v0  ;;  %v3533_v61 = vld [vmem:[#allocation3 + $0x4c8] ss:$16 sps:$4 sm:$0xff]   ;;  %v3634_v0 = vld [vmem:[#allocation5 + $0x74] ss:$8 sps:$4 sm:$0xff]  }
  0xc9   :  { %1826 = vmatprep.subr.bf16.mxu0 %v3468_v63  ;;  %v3629_v63 = vld [vmem:[#allocation5 + $0x60] ss:$8 sps:$4 sm:$0xff]  }
  0xcb   :  { %1909 = vmatpush1.bf16.msra.mxu1 %v3469_v2  ;;  %v3541_v2 = vld [vmem:[#allocation3 + $0x50c] ss:$16 sps:$4 sm:$0xff]  }
  0xcc   :  { %1827 = vmatpush1.bf16.msra.mxu0 %v3466_v1  ;;  %1910 = vmatprep.subr.bf16.mxu1 %v3477_v5  ;;  %v3536_v1 = vld [vmem:[#allocation3 + $0x4e8] ss:$16 sps:$4 sm:$0xff]   ;;  %v3637_v5 = vld [vmem:[#allocation5 + $0x84] ss:$8 sps:$4 sm:$0xff]  }
  0xcd   :  { %1828 = vmatprep.subr.bf16.mxu0 %v3474_v3  ;;  %v3632_v3 = vld [vmem:[#allocation5 + $0x70] ss:$8 sps:$4 sm:$0xff]  }
  0xcf   :  { %1911 = vmatpush1.bf16.msra.mxu1 %v3475_v7  ;;  %v3544_v7 = vld [vmem:[#allocation3 + $0x52c] ss:$16 sps:$4 sm:$0xff]  }
  0xd0   :  { %1829 = vmatpush1.bf16.msra.mxu0 %v3472_v6  ;;  %1912 = vmatprep.subr.bf16.mxu1 %v3483_v9  ;;  %v3539_v6 = vld [vmem:[#allocation3 + $0x508] ss:$16 sps:$4 sm:$0xff]   ;;  %v3640_v9 = vld [vmem:[#allocation5 + $0x94] ss:$8 sps:$4 sm:$0xff]  }
  0xd1   :  { %1830 = vmatprep.subr.bf16.mxu0 %v3480_v8  ;;  %v3635_v8 = vld [vmem:[#allocation5 + $0x80] ss:$8 sps:$4 sm:$0xff]  }
  0xd3   :  { %1913 = vmatpush1.bf16.msra.mxu1 %v3481_v11  ;;  %v3547_v11 = vld [vmem:[#allocation3 + $0x54c] ss:$16 sps:$4 sm:$0xff]  }
  0xd4   :  { %1831 = vmatpush1.bf16.msra.mxu0 %v3478_v10  ;;  %1914 = vmatprep.subr.bf16.mxu1 %v3489_v13  ;;  %v3542_v10 = vld [vmem:[#allocation3 + $0x528] ss:$16 sps:$4 sm:$0xff]   ;;  %v3643_v13 = vld [vmem:[#allocation5 + $0xa4] ss:$8 sps:$4 sm:$0xff]  }
  0xd5   :  { %1832 = vmatprep.subr.bf16.mxu0 %v3486_v12  ;;  %v3638_v12 = vld [vmem:[#allocation5 + $0x90] ss:$8 sps:$4 sm:$0xff]  }
  0xd7   :  { %1915 = vmatpush1.bf16.msra.mxu1 %v3487_v15  ;;  %v3550_v15 = vld [vmem:[#allocation3 + $0x56c] ss:$16 sps:$4 sm:$0xff]  }
  0xd8   :  { %1833 = vmatpush1.bf16.msra.mxu0 %v3484_v14  ;;  %1916 = vmatprep.subr.bf16.mxu1 %v3495_v18  ;;  %v3545_v14 = vld [vmem:[#allocation3 + $0x548] ss:$16 sps:$4 sm:$0xff]   ;;  %v3646_v18 = vld [vmem:[#allocation5 + $0xb4] ss:$8 sps:$4 sm:$0xff]  }
  0xd9   :  { %1834 = vmatprep.subr.bf16.mxu0 %v3492_v16  ;;  %v3641_v16 = vld [vmem:[#allocation5 + $0xa0] ss:$8 sps:$4 sm:$0xff]  }
  0xdb   :  { %1917 = vmatpush1.bf16.msra.mxu1 %v3493_v21  ;;  %v3553_v21 = vld [vmem:[#allocation3 + $0x58c] ss:$16 sps:$4 sm:$0xff]  }
  0xdc   :  { %1835 = vmatpush1.bf16.msra.mxu0 %v3490_v20  ;;  %1918 = vmatprep.subr.bf16.mxu1 %v3501_v23  ;;  %v3548_v20 = vld [vmem:[#allocation3 + $0x568] ss:$16 sps:$4 sm:$0xff]   ;;  %v3649_v23 = vld [vmem:[#allocation5 + $0xc4] ss:$8 sps:$4 sm:$0xff]  }
  0xdd   :  { %1836 = vmatprep.subr.bf16.mxu0 %v3498_v22  ;;  %v3644_v22 = vld [vmem:[#allocation5 + $0xb0] ss:$8 sps:$4 sm:$0xff]  }
  0xdf   :  { %1919 = vmatpush1.bf16.msra.mxu1 %v3499_v26  ;;  %v3556_v26 = vld [vmem:[#allocation3 + $0x5ac] ss:$16 sps:$4 sm:$0xff]  }
  0xe0   :  { %1837 = vmatpush1.bf16.msra.mxu0 %v3496_v24  ;;  %1920 = vmatprep.subr.bf16.mxu1 %v3507_v28  ;;  %v3551_v24 = vld [vmem:[#allocation3 + $0x588] ss:$16 sps:$4 sm:$0xff]   ;;  %v3652_v28 = vld [vmem:[#allocation5 + $0xd4] ss:$8 sps:$4 sm:$0xff]  }
  0xe1   :  { %1838 = vmatprep.subr.bf16.mxu0 %v3504_v27  ;;  %v3647_v27 = vld [vmem:[#allocation5 + $0xc0] ss:$8 sps:$4 sm:$0xff]  }
  0xe3   :  { %1921 = vmatpush1.bf16.msra.mxu1 %v3505_v30  ;;  %v3559_v30 = vld [vmem:[#allocation3 + $0x5cc] ss:$16 sps:$4 sm:$0xff]  }
  0xe4   :  { %1839 = vmatpush1.bf16.msra.mxu0 %v3502_v29  ;;  %1922 = vmatprep.subr.bf16.mxu1 %v3513_v50  ;;  %v3554_v29 = vld [vmem:[#allocation3 + $0x5a8] ss:$16 sps:$4 sm:$0xff]  }
  0xe5   :  { %1840 = vmatprep.subr.bf16.mxu0 %v3510_v32  ;;  %v3650_v32 = vld [vmem:[#allocation5 + $0xd0] ss:$8 sps:$4 sm:$0xff]  }
  0xe6   :  { %v3557_v50 = vld [vmem:[#allocation3 + $0x5c8] ss:$16 sps:$4 sm:$0xff]  }
  0xe7   :  { %1923 = vmatpush1.bf16.msra.mxu1 %v3511_v34  ;;  %v3560_v34 = vld [vmem:[#allocation3 + $0x5e8] ss:$16 sps:$4 sm:$0xff]  }
  0xe8   :  { %1841 = vmatpush1.bf16.msra.mxu0 %v3508_v33  ;;  %1933 = vmatprep.subr.bf16.mxu1 %v3517_v36  ;;  %v3562_v33 = vld [vmem:[#allocation3 + $0x5ec] ss:$16 sps:$4 sm:$0xff]  }
  0xe9   :  { %2419 = vmatprep.subr.bf16.mxu0 %v3613_v41  ;;  %v3565_v36 = vld [vmem:[#allocation3 + $0x60c] ss:$16 sps:$4 sm:$0xff]  }
  0xea   :  { %1925 = vmatmul.mubr.bf16.vlgmr.msra.gmra.mrb[4].mxu1 %v3896_v19  ;;  %v3617_v19 = vld [vmem:[#allocation5 + $0x20] ss:$8 sps:$4 sm:$0xff]   ;;  %v3571_v41 = vld [vmem:[#allocation3 + $0x64c] ss:$16 sps:$4 sm:$0xff]  }
  0xeb   :  { %1843 = vmatmul.mubr.bf16.vlgmr.msra.gmra.mrb[0].mxu0 %v3933_v38  ;;  %1934 = vmatpush1.bf16.msra.mxu1 %v3515_v37  ;;  %v3563_v37 = vld [vmem:[#allocation3 + $0x608] ss:$16 sps:$4 sm:$0xff]  }
  0xec   :  { %1965 = vmatprep.mubr.bf16.mxu1 %v3911_v52  ;;  %1935 = vmatprep.subr.bf16.mxu1 %v3520_v39  ;;  %v3620_v52 = vld [vmem:[#allocation5 + $0x30] ss:$8 sps:$4 sm:$0xff]   ;;  %v3568_v39 = vld [vmem:[#allocation3 + $0x62c] ss:$16 sps:$4 sm:$0xff]  }
  0xed   :  { %2420 = vmatpush1.bf16.msra.mxu0 %v3611_v40  ;;  %v3566_v40 = vld [vmem:[#allocation3 + $0x628] ss:$16 sps:$4 sm:$0xff]  }
  0xee   :  { %2421 = vmatprep.subr.bf16.mxu0 %v3616_v17  ;;  %v3574_v17 = vld [vmem:[#allocation3 + $0x66c] ss:$16 sps:$4 sm:$0xff]  }
  0xef   :  { %1936 = vmatpush1.bf16.msra.mxu1 %v3518_v42  ;;  %v3569_v42 = vld [vmem:[#allocation3 + $0x648] ss:$16 sps:$4 sm:$0xff]  }
  0xf0   :  { %1937 = vmatprep.subr.bf16.mxu1 %v3523_v43  ;;  %v3572_v43 = vld [vmem:[#allocation3 + $0x668] ss:$16 sps:$4 sm:$0xff]  }
  0xf1   :  { %2422 = vmatpush1.bf16.msra.mxu0 %v3614_v25  ;;  %v3577_v25 = vld [vmem:[#allocation3 + $0x68c] ss:$16 sps:$4 sm:$0xff]  }
  0xf2   :  { %2423 = vmatprep.subr.bf16.mxu0 %v3619_v45  ;;  %v3575_v45 = vld [vmem:[#allocation3 + $0x688] ss:$16 sps:$4 sm:$0xff]  }
  0xf3   :  { %1938 = vmatpush1.bf16.msra.mxu1 %v3521_v46  ;;  %v3580_v46 = vld [vmem:[#allocation3 + $0x6ac] ss:$16 sps:$4 sm:$0xff]  }
  0xf4   :  { %1939 = vmatprep.subr.bf16.mxu1 %v3526_v47  ;;  %v3583_v47 = vld [vmem:[#allocation3 + $0x6cc] ss:$16 sps:$4 sm:$0xff]  }
  0xf5   :  { %2424 = vmatpush1.bf16.msra.mxu0 %v3617_v19  ;;  %v3655_v19 = vld [vmem:[#allocation5 + $0xe4] ss:$8 sps:$4 sm:$0xff]  }
  0xf6   :  { %2425 = vmatprep.subr.bf16.mxu0 %v3622_v49 }
  0xf7   :  { %1940 = vmatpush1.bf16.msra.mxu1 %v3524_v48  ;;  %v3653_v48 = vld [vmem:[#allocation5 + $0xe0] ss:$8 sps:$4 sm:$0xff]  }
  0xf8   :  { %1941 = vmatprep.subr.bf16.mxu1 %v3529_v4 }
  0xf9   :  { %2426 = vmatpush1.bf16.msra.mxu0 %v3620_v52  ;;  %v3581_v52 = vld [vmem:[#allocation3 + $0x6c8] ss:$16 sps:$4 sm:$0xff]  }
  0xfa   :  { %2427 = vmatprep.subr.bf16.mxu0 %v3625_v51 }
  0xfb   :  { %1942 = vmatpush1.bf16.msra.mxu1 %v3527_v53  ;;  %v3586_v53 = vld [vmem:[#allocation3 + $0x6ec] ss:$16 sps:$4 sm:$0xff]  }
  0xfc   :  { %1943 = vmatprep.subr.bf16.mxu1 %v3532_v54  ;;  %v3658_v54 = vld [vmem:[#allocation5 + $0xf4] ss:$8 sps:$4 sm:$0xff]  }
  0xfd   :  { %2428 = vmatpush1.bf16.msra.mxu0 %v3623_v55  ;;  %v3656_v55 = vld [vmem:[#allocation5 + $0xf0] ss:$8 sps:$4 sm:$0xff]  }
  0xfe   :  { %2429 = vmatprep.subr.bf16.mxu0 %v3628_v56  ;;  %v3584_v56 = vld [vmem:[#allocation3 + $0x6e8] ss:$16 sps:$4 sm:$0xff]  }
  0xff   :  { %1944 = vmatpush1.bf16.msra.mxu1 %v3530_v57  ;;  %v3589_v57 = vld [vmem:[#allocation3 + $0x70c] ss:$16 sps:$4 sm:$0xff]  }
 0x100   :  { %1945 = vmatprep.subr.bf16.mxu1 %v3535_v58  ;;  %v3661_v58 = vld [vmem:[#allocation5 + $0x104] ss:$8 sps:$4 sm:$0xff]  }
 0x101   :  { %2430 = vmatpush1.bf16.msra.mxu0 %v3626_v59  ;;  %v3587_v59 = vld [vmem:[#allocation3 + $0x708] ss:$16 sps:$4 sm:$0xff]  }
 0x102   :  { %2431 = vmatprep.subr.bf16.mxu0 %v3631_v60  ;;  %v3592_v60 = vld [vmem:[#allocation3 + $0x72c] ss:$16 sps:$4 sm:$0xff]  }
 0x103   :  { %1946 = vmatpush1.bf16.msra.mxu1 %v3533_v61  ;;  %v3590_v61 = vld [vmem:[#allocation3 + $0x728] ss:$16 sps:$4 sm:$0xff]  }
 0x104   :  { %1947 = vmatprep.subr.bf16.mxu1 %v3538_v62  ;;  %v3595_v62 = vld [vmem:[#allocation3 + $0x74c] ss:$16 sps:$4 sm:$0xff]  }
 0x105   :  { %2432 = vmatpush1.bf16.msra.mxu0 %v3629_v63  ;;  %v3593_v63 = vld [vmem:[#allocation3 + $0x748] ss:$16 sps:$4 sm:$0xff]  }
 0x106   :  { %2433 = vmatprep.subr.bf16.mxu0 %v3634_v0  ;;  %v3598_v0 = vld [vmem:[#allocation3 + $0x76c] ss:$16 sps:$4 sm:$0xff]  }
 0x107   :  { %1948 = vmatpush1.bf16.msra.mxu1 %v3536_v1  ;;  %v3596_v1 = vld [vmem:[#allocation3 + $0x768] ss:$16 sps:$4 sm:$0xff]  }
 0x108   :  { %1949 = vmatprep.subr.bf16.mxu1 %v3541_v2  ;;  %v3601_v2 = vld [vmem:[#allocation3 + $0x78c] ss:$16 sps:$4 sm:$0xff]  }
 0x109   :  { %2434 = vmatpush1.bf16.msra.mxu0 %v3632_v3  ;;  %v3599_v3 = vld [vmem:[#allocation3 + $0x788] ss:$16 sps:$4 sm:$0xff]  }
 0x10a   :  { %2435 = vmatprep.subr.bf16.mxu0 %v3637_v5  ;;  %v3604_v5 = vld [vmem:[#allocation3 + $0x7ac] ss:$16 sps:$4 sm:$0xff]  }
 0x10b   :  { %1950 = vmatpush1.bf16.msra.mxu1 %v3539_v6  ;;  %v3602_v6 = vld [vmem:[#allocation3 + $0x7a8] ss:$16 sps:$4 sm:$0xff]  }
 0x10c   :  { %1951 = vmatprep.subr.bf16.mxu1 %v3544_v7  ;;  %v3607_v7 = vld [vmem:[#allocation3 + $0x7cc] ss:$16 sps:$4 sm:$0xff]  }
 0x10d   :  { %2436 = vmatpush1.bf16.msra.mxu0 %v3635_v8  ;;  %v3605_v8 = vld [vmem:[#allocation3 + $0x7c8] ss:$16 sps:$4 sm:$0xff]  }
 0x10e   :  { %2437 = vmatprep.subr.bf16.mxu0 %v3640_v9  ;;  %v3610_v9 = vld [vmem:[#allocation3 + $0x7ec] ss:$16 sps:$4 sm:$0xff]  }
 0x10f   :  { %1952 = vmatpush1.bf16.msra.mxu1 %v3542_v10  ;;  %v3608_v10 = vld [vmem:[#allocation3 + $0x7e8] ss:$16 sps:$4 sm:$0xff]  }
 0x110   :  { %1953 = vmatprep.subr.bf16.mxu1 %v3547_v11  ;;  %v389_v11 = vsub.s32 0, %v3881_v44 }
 0x111   :  { %2438 = vmatpush1.bf16.msra.mxu0 %v3638_v12  ;;  %v3945_v12 = vld [vmem:[%s4043_s3] sm:$0xf] }
 0x112   :  { %2439 = vmatprep.subr.bf16.mxu0 %v3643_v13  ;;  %v393_v13 = vsub.s32 1, %v3881_v44 }
 0x113   :  { %1954 = vmatpush1.bf16.msra.mxu1 %v3545_v14  ;;  %v390_v14 = vrot.slane %v3945_v12, %v389_v11 }
 0x114   :  { %1955 = vmatprep.subr.bf16.mxu1 %v3550_v15  ;;  %v394_v15 = vrot.slane %v3945_v12, %v393_v13 }
 0x115   :  { %2440 = vmatpush1.bf16.msra.mxu0 %v3641_v16 }
 0x116   :  { %2441 = vmatprep.subr.bf16.mxu0 %v3646_v18 }
 0x117   :  { %1956 = vmatpush1.bf16.msra.mxu1 %v3548_v20 }
 0x118   :  { %1957 = vmatprep.subr.bf16.mxu1 %v3553_v21 }
 0x119   :  { %2442 = vmatpush1.bf16.msra.mxu0 %v3644_v22 }
 0x11a   :  { %2443 = vmatprep.subr.bf16.mxu0 %v3649_v23 }
 0x11b   :  { %1958 = vmatpush1.bf16.msra.mxu1 %v3551_v24 }
 0x11c   :  { %1959 = vmatprep.subr.bf16.mxu1 %v3556_v26 }
 0x11d   :  { %2444 = vmatpush1.bf16.msra.mxu0 %v3647_v27 }
 0x11e   :  { %2445 = vmatprep.subr.bf16.mxu0 %v3652_v28 }
 0x11f   :  { %1960 = vmatpush1.bf16.msra.mxu1 %v3554_v29  ;;  %v3659_v29 = vld [vmem:[#allocation5 + $0x100] ss:$8 sps:$4 sm:$0xff]  }
 0x120   :  { %1961 = vmatprep.subr.bf16.mxu1 %v3559_v30 }
 0x121   :  { %2446 = vmatpush1.bf16.msra.mxu0 %v3650_v32  ;;  %v3664_v32 = vld [vmem:[#allocation5 + $0x114] ss:$8 sps:$4 sm:$0xff]  }
 0x122   :  { %2447 = vmatprep.subr.bf16.mxu0 %v3655_v19  ;;  %v3686_v19 = vld [vmem:[#allocation5 + $0x190] ss:$8 sps:$4 sm:$0xff]  }
 0x123   :  { %1962 = vmatpush1.bf16.msra.mxu1 %v3557_v50  ;;  %v3662_v50 = vld [vmem:[#allocation5 + $0x110] ss:$8 sps:$4 sm:$0xff]  }
 0x124   :  { %1963 = vmatprep.subr.bf16.mxu1 %v3562_v33  ;;  %v3667_v33 = vld [vmem:[#allocation5 + $0x124] ss:$8 sps:$4 sm:$0xff]  }
 0x125   :  { %2448 = vmatpush1.bf16.msra.mxu0 %v3653_v48  ;;  %v3689_v48 = vld [vmem:[#allocation5 + $0x1a0] ss:$8 sps:$4 sm:$0xff]  }
 0x126   :  { %2449 = vmatprep.subr.bf16.mxu0 %v3658_v54  ;;  %v3698_v54 = vld [vmem:[#allocation5 + $0x1d0] ss:$8 sps:$4 sm:$0xff]  }
 0x127   :  { %1964 = vmatpush1.bf16.msra.mxu1 %v3560_v34  ;;  %v3665_v34 = vld [vmem:[#allocation5 + $0x120] ss:$8 sps:$4 sm:$0xff]  }
 0x128   :  { %1974 = vmatprep.subr.bf16.mxu1 %v3565_v36  ;;  %v3670_v36 = vld [vmem:[#allocation5 + $0x134] ss:$8 sps:$4 sm:$0xff]  }
 0x129   :  { %2450 = vmatpush1.bf16.msra.mxu0 %v3656_v55  ;;  %v3703_v55 = vld [vmem:[#allocation5 + $0x1e4] ss:$8 sps:$4 sm:$0xff]  }
 0x12a   :  { %1966 = vmatmul.mubr.bf16.vlgmr.msra.gmra.mrb[4].mxu1 %v3923_v31  ;;  %v3578_v31 = vld [vmem:[#allocation3 + $0x6a8] ss:$16 sps:$4 sm:$0xff]   ;;  %2460 = vmatprep.subr.bf16.mxu0 %v3661_v58 }
 0x12b   :  { %1975 = vmatpush1.bf16.msra.mxu1 %v3563_v37  ;;  %2006 = vmatprep.mubr.bf16.mxu1 %v3925_v35  ;;  %v3668_v37 = vld [vmem:[#allocation5 + $0x130] ss:$8 sps:$4 sm:$0xff]  }
 0x12c   :  { %1976 = vmatprep.subr.bf16.mxu1 %v3568_v39  ;;  %v3673_v39 = vld [vmem:[#allocation5 + $0x144] ss:$8 sps:$4 sm:$0xff]   ;;  %v3704_v58 = vld [vmem:[#allocation5 + $0x1f0] ss:$8 sps:$4 sm:$0xff]  }
 0x12f   :  { %1977 = vmatpush1.bf16.msra.mxu1 %v3566_v40  ;;  %v3671_v40 = vld [vmem:[#allocation5 + $0x140] ss:$8 sps:$4 sm:$0xff]  }
 0x130   :  { %1978 = vmatprep.subr.bf16.mxu1 %v3571_v41  ;;  %v3676_v41 = vld [vmem:[#allocation5 + $0x154] ss:$8 sps:$4 sm:$0xff]  }
 0x133   :  { %1979 = vmatpush1.bf16.msra.mxu1 %v3569_v42  ;;  %v3674_v42 = vld [vmem:[#allocation5 + $0x150] ss:$8 sps:$4 sm:$0xff]  }
 0x134   :  { %1980 = vmatprep.subr.bf16.mxu1 %v3574_v17  ;;  %v3679_v17 = vld [vmem:[#allocation5 + $0x164] ss:$8 sps:$4 sm:$0xff]  }
 0x137   :  { %1981 = vmatpush1.bf16.msra.mxu1 %v3572_v43  ;;  %v3677_v43 = vld [vmem:[#allocation5 + $0x160] ss:$8 sps:$4 sm:$0xff]  }
 0x138   :  { %1982 = vmatprep.subr.bf16.mxu1 %v3577_v25  ;;  %v3682_v25 = vld [vmem:[#allocation5 + $0x174] ss:$8 sps:$4 sm:$0xff]  }
 0x13b   :  { %1983 = vmatpush1.bf16.msra.mxu1 %v3575_v45  ;;  %v3680_v45 = vld [vmem:[#allocation5 + $0x170] ss:$8 sps:$4 sm:$0xff]  }
 0x13c   :  { %1984 = vmatprep.subr.bf16.mxu1 %v3580_v46  ;;  %v3685_v46 = vld [vmem:[#allocation5 + $0x184] ss:$8 sps:$4 sm:$0xff]  }
 0x13d   :  { %v1721_v35 = vpop.f32.mrb[0].mxu1 }
 0x13e   :  { %v1723_v4 = vpop.f32.mrb[1].mxu1  ;;  %v1722_v16 = vadd.f32 %v1721_v35, %v390_v14  ;;  %v3691_v35 = vld [vmem:[#allocation5 + $0x1a4] ss:$8 sps:$4 sm:$0xff]  }
 0x13f   :  { %v1725_v49 = vpop.f32.mrb[2].mxu1  ;;  %1985 = vmatpush1.bf16.msra.mxu1 %v3578_v31  ;;  %v1724_v18 = vadd.f32 %v1723_v4, %v394_v15  ;;  %v3683_v31 = vld [vmem:[#allocation5 + $0x180] ss:$8 sps:$4 sm:$0xff]   ;;  %v3694_v4 = vld [vmem:[#allocation5 + $0x1b4] ss:$8 sps:$4 sm:$0xff]  }
 0x140   :  { %v1726_v51 = vpop.f32.mrb[3].mxu1  ;;  %1986 = vmatprep.subr.bf16.mxu1 %v3583_v47  ;;  %v3688_v47 = vld [vmem:[#allocation5 + $0x194] ss:$8 sps:$4 sm:$0xff]   ;;  %v3692_v49 = vld [vmem:[#allocation5 + $0x1b0] ss:$8 sps:$4 sm:$0xff]   ;;  %v3709_v15 = vld [vmem:[%s4046_s6 + $0x48] sm:$0xff]  }
 0x141   :  { %v3695_v51 = vld [vmem:[#allocation5 + $0x1c0] ss:$8 sps:$4 sm:$0xff]  }
 0x143   :  { %1987 = vmatpush1.bf16.msra.mxu1 %v3581_v52  ;;  %v3697_v52 = vld [vmem:[#allocation5 + $0x1c4] ss:$8 sps:$4 sm:$0xff]  }
 0x144   :  { %1988 = vmatprep.subr.bf16.mxu1 %v3586_v53  ;;  %v3700_v53 = vld [vmem:[#allocation5 + $0x1d4] ss:$8 sps:$4 sm:$0xff]  }
 0x147   :  { %1989 = vmatpush1.bf16.msra.mxu1 %v3584_v56  ;;  %v3701_v56 = vld [vmem:[#allocation5 + $0x1e0] ss:$8 sps:$4 sm:$0xff]  }
 0x148   :  { %1990 = vmatprep.subr.bf16.mxu1 %v3589_v57  ;;  %v3706_v57 = vld [vmem:[#allocation5 + $0x1f4] ss:$8 sps:$4 sm:$0xff]  }
 0x14b   :  { %1991 = vmatpush1.bf16.msra.mxu1 %v3587_v59  ;;  %v3707_v59 = vld [vmem:[%s4046_s6 + $0x40] sm:$0xff]  }
 0x14c   :  { %1992 = vmatprep.subr.bf16.mxu1 %v3592_v60  ;;  %v397_v60 = vsub.s32 2, %v3881_v44 }
 0x14f   :  { %1993 = vmatpush1.bf16.msra.mxu1 %v3590_v61  ;;  %v401_v61 = vsub.s32 3, %v3881_v44  ;;  %v3724_v44 = vld [vmem:[%s4048_s8 + $0x8] sm:$0xff]  }
 0x150   :  { %1994 = vmatprep.subr.bf16.mxu1 %v3595_v62  ;;  %v398_v62 = vrot.slane %v3945_v12, %v397_v60 }
 0x153   :  { %1995 = vmatpush1.bf16.msra.mxu1 %v3593_v63  ;;  %v402_v63 = vrot.slane %v3945_v12, %v401_v61  ;;  %v3710_v12 = vld [vmem:[%s4046_s6 + $0x8] sm:$0xff]   ;;  %v3144_v61 = vld [vmem:[%s4050_s10] ss:$0 sm:$0xff] }
 0x154   :  { %1996 = vmatprep.subr.bf16.mxu1 %v3598_v0 }
 0x157   :  { %1997 = vmatpush1.bf16.msra.mxu1 %v3596_v1 }
 0x158   :  { %1998 = vmatprep.subr.bf16.mxu1 %v3601_v2 }
 0x15b   :  { %1999 = vmatpush1.bf16.msra.mxu1 %v3599_v3 }
 0x15c   :  { %2000 = vmatprep.subr.bf16.mxu1 %v3604_v5 }
 0x15f   :  { %2001 = vmatpush1.bf16.msra.mxu1 %v3602_v6 }
 0x160   :  { %2002 = vmatprep.subr.bf16.mxu1 %v3607_v7 }
 0x163   :  { %2003 = vmatpush1.bf16.msra.mxu1 %v3605_v8 }
 0x164   :  { %2004 = vmatprep.subr.bf16.mxu1 %v3610_v9 }
 0x167   :  { %2005 = vmatpush1.bf16.msra.mxu1 %v3608_v10  ;;  %v3708_v10 = vld [vmem:[%s4046_s6] sm:$0xff]  }
 0x16a   :  { %2007 = vmatmul.mubr.bf16.vlgmr.msra.gmra.mrb[4].mxu1 %v3933_v38 }
 0x1be   :  { %v1844_v38 = vpop.f32.mrb[0].mxu0 }
 0x1bf   :  { %v3181_v20 = vadd.f32 %v1844_v38, %v1722_v16  ;;  %v1846_v21 = vpop.f32.mrb[1].mxu0  ;;  %v3711_v16 = vld [vmem:[%s4046_s6 + $0x50] sm:$0xff]   ;;  %v3713_v38 = vld [vmem:[%s4046_s6 + $0x58] sm:$0xff]  }
 0x1c0   :  { %v3183_v22 = vadd.f32 %v1846_v21, %v1724_v18  ;;  %v1848_v23 = vpop.f32.mrb[2].mxu0  ;;  %v3712_v18 = vld [vmem:[%s4046_s6 + $0x10] sm:$0xff]   ;;  %v3715_v21 = vld [vmem:[%s4046_s6 + $0x60] sm:$0xff]  }
 0x1c1   :  { %v2015_v24 = vmax.f32 %v3181_v20, 0.0  ;;  %v1849_v26 = vpop.f32.mrb[3].mxu0  ;;  %v3714_v20 = vld [vmem:[%s4046_s6 + $0x18] sm:$0xff]   ;;  %v3717_v23 = vld [vmem:[%s4046_s6 + $0x68] sm:$0xff]  }
 0x1c2   :  { %v2016_v27 = vmax.f32 %v3183_v22, 0.0  ;;  %v3716_v22 = vld [vmem:[%s4046_s6 + $0x20] sm:$0xff]   ;;  %v3719_v26 = vld [vmem:[%s4046_s6 + $0x70] sm:$0xff]  }
 0x1c3   :  { %v2019_v30 = vpack.c.bf16 %v2015_v24, %v2015_v24  ;;  %v3718_v24 = vld [vmem:[%s4046_s6 + $0x28] sm:$0xff]  }
 0x1c4   :  { %v2020_v28 = vpack.c.bf16 %v2016_v27, %v2016_v27  ;;  %v3720_v27 = vld [vmem:[%s4046_s6 + $0x30] sm:$0xff]  }
 0x1c6   :  { %2451 = vmatprep.mubr.bf16.mxu0 %v2020_v28  ;;  %v3721_v28 = vld [vmem:[%s4046_s6 + $0x78] sm:$0xff]  }
 0x1c7   :  { %2452 = vmatmul.mubr.bf16.vlgmr.msra.gmra.mrb[4].mxu0 %v2019_v30  ;;  %v2087_v30 = vld [vmem:[%s4045_s5] sm:$0x3] }
 0x1c8   :  { %2461 = vmatpush1.bf16.msra.mxu0 %v3659_v29  ;;  %v3722_v29 = vld [vmem:[%s4046_s6 + $0x38] sm:$0xff]  }
 0x1c9   :  { %2462 = vmatprep.subr.bf16.mxu0 %v3664_v32  ;;  %v2092_v32 = vrot.slane %v2087_v30, %v389_v11  ;;  %v3780_v11 = vmov 0.0  }
 0x1ca   :  { %3172 = vmatprep.subr.bf16.mxu1 %v3780_v11  ;;  %3176 = vmatprep.mubr.msk.bf16.mxu1 %vm3781_vm0, %v3780_v11 }
 0x1cc   :  { %2463 = vmatpush1.bf16.msra.mxu0 %v3662_v50  ;;  %v2096_v50 = vrot.slane %v2087_v30, %v393_v13  ;;  %v2681_v13 = vld [vmem:[%s4041_s1] sm:$0x3] }
 0x1cd   :  { %2464 = vmatprep.subr.bf16.mxu0 %v3667_v33 }
 0x1d0   :  { %2465 = vmatpush1.bf16.msra.mxu0 %v3665_v34 }
 0x1d1   :  { %2466 = vmatprep.subr.bf16.mxu0 %v3670_v36 }
 0x1d4   :  { %2467 = vmatpush1.bf16.msra.mxu0 %v3668_v37 }
 0x1d5   :  { %2468 = vmatprep.subr.bf16.mxu0 %v3673_v39 }
 0x1d8   :  { %2469 = vmatpush1.bf16.msra.mxu0 %v3671_v40 }
 0x1d9   :  { %2470 = vmatprep.subr.bf16.mxu0 %v3676_v41 }
 0x1dc   :  { %2471 = vmatpush1.bf16.msra.mxu0 %v3674_v42 }
 0x1dd   :  { %2472 = vmatprep.subr.bf16.mxu0 %v3679_v17 }
 0x1e0   :  { %2473 = vmatpush1.bf16.msra.mxu0 %v3677_v43 }
 0x1e1   :  { %2474 = vmatprep.subr.bf16.mxu0 %v3682_v25  ;;  %v3723_v25 = vld [vmem:[%s4048_s8] sm:$0xff]  }
 0x1e2   :  { %3173 = vmatpush3.bf16.msra.mxu1 %v3723_v25 }
 0x1e3   :  { %3174 = vmatprep.subr.bf16.mxu1 %v3780_v11 }
 0x1e4   :  { %2475 = vmatpush1.bf16.msra.mxu0 %v3680_v45  ;;  %v3782_v45 = vmov 0  }
 0x1e5   :  { %2476 = vmatprep.subr.bf16.mxu0 %v3685_v46  ;;  %3223 = vset.pattern.permute.xlu0 %v3782_v45  ;;  %v3783_v46 = vmov 1  }
 0x1e6   :  { %3175 = vmatpush3.bf16.msra.mxu1 %v3724_v44  ;;  %2685 = vperm.xlu0 %3223, %v2681_v13  }
 0x1e8   :  { %2477 = vmatpush1.bf16.msra.mxu0 %v3683_v31 }
 0x1e9   :  { %2478 = vmatprep.subr.bf16.mxu0 %v3688_v47  ;;  %v3122_v47 = vld [vmem:[%s4047_s7] ss:$0 sm:$0xff] }
 0x1ea   :  { %3224 = vset.pattern.permute.xlu0 %v3783_v46 }
 0x1eb   :  { %2695 = vperm.xlu0 %3224, %v2681_v13  }
 0x1ec   :  { %2479 = vmatpush1.bf16.msra.mxu0 %v3686_v19 }
 0x1ed   :  { %2480 = vmatprep.subr.bf16.mxu0 %v3691_v35 }
 0x1f0   :  { %2481 = vmatpush1.bf16.msra.mxu0 %v3689_v48 }
 0x1f1   :  { %2482 = vmatprep.subr.bf16.mxu0 %v3694_v4 }
 0x1f4   :  { %2483 = vmatpush1.bf16.msra.mxu0 %v3692_v49 }
 0x1f5   :  { %2484 = vmatprep.subr.bf16.mxu0 %v3697_v52 }
 0x1f8   :  { %2485 = vmatpush1.bf16.msra.mxu0 %v3695_v51 }
 0x1f9   :  { %2486 = vmatprep.subr.bf16.mxu0 %v3700_v53 }
 0x1fc   :  { %2487 = vmatpush1.bf16.msra.mxu0 %v3698_v54  ;;  %v3139_v54 = vld [vmem:[%s4049_s9] ss:$0 sm:$0xff] }
 0x1fd   :  { %2488 = vmatprep.subr.bf16.mxu0 %v3703_v55  ;;  %v3140_v55 = vld [vmem:[%s4049_s9 + $0x1] ss:$0 sm:$0xff] }
 0x200   :  { %2489 = vmatpush1.bf16.msra.mxu0 %v3701_v56 }
 0x201   :  { %2490 = vmatprep.subr.bf16.mxu0 %v3706_v57 }
 0x204   :  { %2491 = vmatpush1.bf16.msra.mxu0 %v3704_v58 }
 0x205   :  { %3147 = vmatprep.subr.bf16.mxu0 %v3707_v59 }
 0x23d   :  { %v2008_v0 = vpop.f32.mrb[4].mxu1 }
 0x23e   :  { %v3184_v1 = vadd.f32 %v2008_v0, %v398_v62  ;;  %v2010_v2 = vpop.f32.mrb[5].mxu1 }
 0x23f   :  { %v3185_v3 = vadd.f32 %v2010_v2, %v402_v63  ;;  %v2012_v5 = vpop.f32.mrb[6].mxu1 }
 0x240   :  { %v2017_v6 = vmax.f32 %v3184_v1, 0.0  ;;  %v2013_v7 = vpop.f32.mrb[7].mxu1 }
 0x241   :  { %v2018_v8 = vmax.f32 %v3185_v3, 0.0  ;;  %v3145_v3 = vld [vmem:[%s4051_s11] ss:$0 sm:$0xff] }
 0x242   :  { %v2021_v14 = vpack.c.bf16 %v2017_v6, %v2017_v6 }
 0x243   :  { %v2022_v9 = vpack.c.bf16 %v2018_v8, %v2018_v8  ;;  %v3146_v8 = vld [vmem:[#allocation2] ss:$0 sm:$0xff] }
 0x245   :  { %2492 = vmatprep.mubr.bf16.mxu0 %v2022_v9 }
 0x246   :  { %2493 = vmatmul.mubr.bf16.vlgmr.msra.gmra.mrb[4].mxu0 %v2021_v14 }
 0x247   :  { %3148 = vmatpush3.bf16.msra.mxu0 %v3708_v10 }
 0x248   :  { %3149 = vmatprep.subr.bf16.mxu0 %v3709_v15 }
 0x24b   :  { %3150 = vmatpush3.bf16.msra.mxu0 %v3710_v12 }
 0x24c   :  { %3151 = vmatprep.subr.bf16.mxu0 %v3711_v16 }
 0x24f   :  { %3152 = vmatpush3.bf16.msra.mxu0 %v3712_v18 }
 0x250   :  { %3153 = vmatprep.subr.bf16.mxu0 %v3713_v38 }
 0x253   :  { %3154 = vmatpush3.bf16.msra.mxu0 %v3714_v20 }
 0x254   :  { %3155 = vmatprep.subr.bf16.mxu0 %v3715_v21 }
 0x257   :  { %3156 = vmatpush3.bf16.msra.mxu0 %v3716_v22 }
 0x258   :  { %3157 = vmatprep.subr.bf16.mxu0 %v3717_v23 }
 0x25b   :  { %3158 = vmatpush3.bf16.msra.mxu0 %v3718_v24 }
 0x25c   :  { %3159 = vmatprep.subr.bf16.mxu0 %v3719_v26 }
 0x25f   :  { %3160 = vmatpush3.bf16.msra.mxu0 %v3720_v27 }
 0x260   :  { %3161 = vmatprep.subr.bf16.mxu0 %v3721_v28 }
 0x263   :  { %3162 = vmatpush3.bf16.msra.mxu0 %v3722_v29 }
 0x265   :  { %v2686_v53 = vpop.permute.xlu0 %2685 }
 0x266   :  { %v2692_v57 = vmul.f32 %v3139_v54, %v2686_v53 }
 0x26a   :  { %v2696_v56 = vpop.permute.xlu0 %2695 }
 0x26b   :  { %v2702_v58 = vmul.f32 %v3140_v55, %v2696_v56 }
 0x26d   :  { %v2703_v59 = vadd.f32 %v2702_v58, %v2692_v57 }
 0x319   :  { %v2494_v33 = vpop.f32.mrb[4].mxu0 }
 0x31a   :  { %v3186_v34 = vadd.f32 %v2494_v33, %v2092_v32  ;;  %v2496_v36 = vpop.f32.mrb[5].mxu0 }
 0x31b   :  { %v3187_v37 = vadd.f32 %v2496_v36, %v2096_v50  ;;  %v2498_v39 = vpop.f32.mrb[6].mxu0 }
 0x31c   :  { %v2501_v40 = vmax.f32 %v3186_v34, 0.0  ;;  %v2499_v41 = vpop.f32.mrb[7].mxu0 }
 0x31d   :  { %v2502_v42 = vmax.f32 %v3187_v37, 0.0 }
 0x31e   :  { %v2503_v43 = vpack.c.bf16 %v2501_v40, %v2501_v40 }
 0x31f   :  { %v2504_v17 = vpack.c.bf16 %v2502_v42, %v2502_v42 }
 0x321   :  { %2672 = vmatprep.mubr.bf16.mxu0 %v2504_v17 }
 0x322   :  { %2673 = vmatmul.mubr.bf16.vlgmr.msra.gmra.mrb[8].mxu0 %v2503_v43 }
 0x3f5   :  { %v3163_v31 = vpop.f32.mrb[8].mxu0 }
 0x3f6   :  { %v3164_v19 = vpop.f32.mrb[9].mxu0 }
 0x3f7   :  { %v3165_v35 = vadd.f32 %v3164_v19, %v3163_v31  ;;  %v3166_v48 = vpop.f32.mrb[10].mxu0 }
 0x3f8   :  { %v3167_v4 = vpop.f32.mrb[11].mxu0 }
 0x3f9   :  { %v2675_v49 = vadd.f32 %v3165_v35, %v3122_v47 }
 0x3fb   :  { %v2680_v52 = vmax.f32 %v2675_v49, 0.0 }
 0x3fd   :  { %v2704_v51 = vpack.c.bf16 %v2680_v52, %v2680_v52 }
 0x3ff   :  { %3177 = vmatmul.mubr.msk.bf16.vlgmr.msra.gmra.mrb[8].mxu1 %vm2721_vm1, %v2704_v51 }
 0x4d2   :  { %v2759_v60 = vpop.f32.mrb[8].mxu1 }
 0x4d3   :  { %v2760_v62 = vadd.f32 %v2759_v60, %v2703_v59  ;;  %v3178_v63 = vpop.f32.mrb[9].mxu1 }
 0x4d4   :  { %v2762_v0 = vpop.f32.mrb[10].mxu1 }
 0x4d5   :  { %v2772_v1 = vadd.f32 %v3144_v61, %v2760_v62  ;;  %v3179_v2 = vpop.f32.mrb[11].mxu1 }
 0x4d7   :  { %v2773_v5 = vmax.f32 %v2772_v1, 0.0 }
 0x4d9   :  { %v2781_v6 = vmul.f32 %v3145_v3, %v2773_v5 }
 0x4db   :  { %v2783_v7 = vsel %vm2782_vm2, %v2781_v6, 0.0 }
 0x4dc   :  { %2784 = vadd.xlane.f32.xlu1 %v2783_v7 }
 0x569   :  { %v2785_v9 = vpop.xlane.xlu1 %2784 }
 0x56a   :  { %v2793_v10 = vadd.f32 %v3146_v8, %v2785_v9 }
 0x56c   :  { %2795 = vst.msk [vmem:[%s4053_s13] sm:$0x3] %vm2794_vm3, %v2793_v10 }
 0x56d   :  { %2800 = vsyncpa [#allocation4], 1 }
 0x56e   :  { %2801 = vsyncpa [#allocation6], 1 }

</bundles_post_ra>
